<compile_context>
chip_gen: v6e
topology: v6e:2x2x1
jax: 0.10.0
libtpu: 0.0.40
codegen_flags: <defaults>
</compile_context>

<pallas_src>
import math
import jax
import jax.numpy as jnp
from jax.experimental import pallas as pl
from jax.experimental import pallas as _pl_unused  # keep namespace tidy
from jax.experimental.pallas import tpu as pltpu  # noqa: F401  (not needed for gridless call)

# ----- small DistilBERT-style config -----
VOCAB      = 64
MAX_POS    = 32
HIDDEN     = 32
N_HEADS    = 4
HEAD_DIM   = HIDDEN // N_HEADS
N_LAYERS   = 2
FFN_DIM    = 4 * HIDDEN           # 128
NUM_LABELS = 3
LN_EPS     = 1e-12
B, S       = 2, 8
T          = B * S                # flattened token count
LANE       = 128                  # TPU lane width / padded minor dim

MASK_NEG = -1e30                  # additive mask value (equiv. to masked_fill finfo.min)

# ----- packed 1-D parameter ("vecs") row layout: one (1,128) row per vector -----
VROW_EMB_G, VROW_EMB_B, VROW_CLS_B = 0, 1, 2
VROW_L0 = 3
VROWS_PER_LAYER = 8
(VOFF_BQKV, VOFF_BO, VOFF_LN1G, VOFF_LN1B,
 VOFF_B1, VOFF_B2, VOFF_LN2G, VOFF_LN2B) = range(VROWS_PER_LAYER)
N_VEC_ROWS_RAW = VROW_L0 + N_LAYERS * VROWS_PER_LAYER     # 19
N_VEC_ROWS = 24                                           # pad sublanes to multiple of 8


# ---------------- in-kernel math helpers ----------------
def _layernorm(x, gamma, beta):
    mu = jnp.mean(x, axis=-1, keepdims=True)
    var = jnp.mean(jnp.square(x - mu), axis=-1, keepdims=True)
    return (x - mu) * jax.lax.rsqrt(var + LN_EPS) * gamma + beta


def _gelu_tanh(x):
    # tanh-approximation GELU (EUP tanh, no VALU-heavy erf polynomial).
    # TODO(synk): ~1e-3 relative difference vs the exact-erf GELU used by torch F.gelu.
    return 0.5 * x * (1.0 + jnp.tanh(0.7978845608028654 * (x + 0.044715 * x * x * x)))


# ---------------- the single fused kernel ----------------
def fused_model_kernel(emb_ref, mask_ref, vec_ref, wqkv_ref, wo_ref,
                       w1_ref, w2_ref, clsw_ref, out_ref):
    """Whole LifeAdvisorModel forward for the full (flattened) batch.

    emb_ref  : (T, H)              token+position embeddings (pre-LayerNorm)
    mask_ref : (T, T)              additive mask: block-diag over examples + key padding
    vec_ref  : (N_VEC_ROWS, 128)   all 1-D params, one padded row each
    wqkv_ref : (L, H, 128)         [Wq*scale | Wk | Wv | 0-pad] per layer
    wo_ref   : (L, H, H)           attention output projection
    w1_ref   : (L, H, FFN)         FFN up projection
    w2_ref   : (L, FFN, H)         FFN down projection
    clsw_ref : (H, 128)            classifier weight, zero-padded past NUM_LABELS
    out_ref  : (T, 128)            lane-dense logits for every token row
    """
    vecs = vec_ref[...]                                   # (24, 128) — 3 vregs, load once
    mask_add = mask_ref[...]                              # (T, T)

    def vrow(r, width=HIDDEN):
        return vecs[r:r + 1, :width]                      # (1, width) static slice

    # embeddings LayerNorm (embedding dropout = identity at inference)
    h = _layernorm(emb_ref[...], vrow(VROW_EMB_G), vrow(VROW_EMB_B))        # (T, H)

    for li in range(N_LAYERS):                            # static unroll, weights resident
        base = VROW_L0 + li * VROWS_PER_LAYER
        x = h

        # ---- fused QKV: one lane-dense matmul; 1/sqrt(dh) already folded into Wq/bq ----
        qkv = jnp.dot(x, wqkv_ref[li], preferred_element_type=jnp.float32)  # (T, 128)
        qkv = qkv + vecs[base + VOFF_BQKV:base + VOFF_BQKV + 1, :]

        # ---- per-head attention on static lane slices (no broadcast copies of x) ----
        ctx_parts = []
        for hd in range(N_HEADS):
            lo = hd * HEAD_DIM
            q_h = qkv[:, lo:lo + HEAD_DIM]                                  # (T, 8)
            k_h = qkv[:, HIDDEN + lo:HIDDEN + lo + HEAD_DIM]                # (T, 8)
            v_h = qkv[:, 2 * HIDDEN + lo:2 * HIDDEN + lo + HEAD_DIM]        # (T, 8)
            s = jax.lax.dot_general(q_h, k_h, (((1,), (1,)), ((), ())),
                                    preferred_element_type=jnp.float32)     # (T, T)
            s = s + mask_add
            m = jnp.max(s, axis=-1, keepdims=True)
            p = jnp.exp(s - m)
            p = p * pl.reciprocal(jnp.sum(p, axis=-1, keepdims=True), approx=True)
            ctx_parts.append(jnp.dot(p, v_h, preferred_element_type=jnp.float32))
        ctx = jnp.concatenate(ctx_parts, axis=-1)                           # (T, H)

        # ---- single output-projection matmul (head concat folded into lane layout) ----
        sa = jnp.dot(ctx, wo_ref[li], preferred_element_type=jnp.float32)
        sa = sa + vrow(base + VOFF_BO)
        h1 = _layernorm(sa + x, vrow(base + VOFF_LN1G), vrow(base + VOFF_LN1B))

        # ---- FFN ----
        f = jnp.dot(h1, w1_ref[li], preferred_element_type=jnp.float32)     # (T, FFN)
        f = f + vecs[base + VOFF_B1:base + VOFF_B1 + 1, :FFN_DIM]
        f = _gelu_tanh(f)
        f = jnp.dot(f, w2_ref[li], preferred_element_type=jnp.float32)      # (T, H)
        f = f + vrow(base + VOFF_B2)
        h = _layernorm(f + h1, vrow(base + VOFF_LN2G), vrow(base + VOFF_LN2B))

    # ---- lane-dense classifier on ALL rows; dropout(0.3) = identity at inference ----
    logits = jnp.dot(h, clsw_ref[...], preferred_element_type=jnp.float32)  # (T, 128)
    out_ref[...] = logits + vecs[VROW_CLS_B:VROW_CLS_B + 1, :]


# ---------------- wrapper ----------------
def life_advisor_forward(params, input_ids, attention_mask):
    # Embedding lookup (data-dependent gather) + position add are plain-JAX glue;
    # everything downstream runs inside the single fused Pallas kernel.
    pos = params["pos_emb"][:S]                                             # (S, H)
    emb = (params["word_emb"][input_ids] + pos[None, :, :]).reshape(T, HIDDEN)

    # Additive attention mask over the flattened token axis:
    #   block-diagonal (no cross-example attention) AND key-padding (mask == 0).
    am = attention_mask.reshape(-1).astype(jnp.float32)                     # (T,)
    batch_ids = jnp.repeat(jnp.arange(B), S)                                # (T,)
    keep = (batch_ids[:, None] == batch_ids[None, :]) & (am[None, :] > 0.0)
    mask_add = jnp.where(keep, 0.0, MASK_NEG).astype(jnp.float32)           # (T, T)

    p = params
    logits_all = pl.pallas_call(
        fused_model_kernel,
        out_shape=jax.ShapeDtypeStruct((T, LANE), jnp.float32),
    )(emb, mask_add, p["vecs"], p["wqkv"], p["wo"], p["w1"], p["w2"], p["cls_w_pad"])

    # CLS rows sit at flattened positions 0, S, 2S, ...; only first NUM_LABELS lanes are real.
    return logits_all[0::S, :NUM_LABELS]


# ---------------- deterministic parameter init (torch-equivalent layout) ----------------
def init_params(key):
    """Linear weights stored as (in_features, out_features): y = x @ W + b (W = W_torch.T)."""
    keys = jax.random.split(key, 4 + N_LAYERS)

    def dense(k, din, dout):
        return 0.02 * jax.random.normal(k, (din, dout), jnp.float32)

    params = {
        "word_emb": 0.02 * jax.random.normal(keys[0], (VOCAB, HIDDEN), jnp.float32),
        "pos_emb": 0.02 * jax.random.normal(keys[1], (MAX_POS, HIDDEN), jnp.float32),
        "emb_ln_g": jnp.ones((1, HIDDEN), jnp.float32),
        "emb_ln_b": jnp.zeros((1, HIDDEN), jnp.float32),
        "cls_w": dense(keys[2], HIDDEN, NUM_LABELS),
        "cls_b": jnp.zeros((1, NUM_LABELS), jnp.float32),
        "layers": [],
    }
    for li in range(N_LAYERS):
        lk = jax.random.split(keys[4 + li], 6)
        params["layers"].append({
            "wq": dense(lk[0], HIDDEN, HIDDEN), "bq": jnp.zeros((1, HIDDEN), jnp.float32),
            "wk": dense(lk[1], HIDDEN, HIDDEN), "bk": jnp.zeros((1, HIDDEN), jnp.float32),
            "wv": dense(lk[2], HIDDEN, HIDDEN), "bv": jnp.zeros((1, HIDDEN), jnp.float32),
            "wo": dense(lk[3], HIDDEN, HIDDEN), "bo": jnp.zeros((1, HIDDEN), jnp.float32),
            "ln1_g": jnp.ones((1, HIDDEN), jnp.float32),
            "ln1_b": jnp.zeros((1, HIDDEN), jnp.float32),
            "w1": dense(lk[4], HIDDEN, FFN_DIM), "b1": jnp.zeros((1, FFN_DIM), jnp.float32),
            "w2": dense(lk[5], FFN_DIM, HIDDEN), "b2": jnp.zeros((1, HIDDEN), jnp.float32),
            "ln2_g": jnp.ones((1, HIDDEN), jnp.float32),
            "ln2_b": jnp.zeros((1, HIDDEN), jnp.float32),
        })
    return params


# ---------------- packing: 8 kernel operands total ----------------
def pack_params(raw):
    L = raw["layers"]
    scale = 1.0 / math.sqrt(HEAD_DIM)

    def pad_lanes(a, width=LANE):
        return jnp.pad(a, [(0, 0)] * (a.ndim - 1) + [(0, width - a.shape[-1])])

    # fused QKV weight (scale folded into Q columns), zero-padded to 128 lanes
    wqkv = jnp.stack([
        pad_lanes(jnp.concatenate([lp["wq"] * scale, lp["wk"], lp["wv"]], axis=1))
        for lp in L])                                        # (L, H, 128)
    wo = jnp.stack([lp["wo"] for lp in L])                   # (L, H, H)
    w1 = jnp.stack([lp["w1"] for lp in L])                   # (L, H, FFN)
    w2 = jnp.stack([lp["w2"] for lp in L])                   # (L, FFN, H)

    def vec_row(v):
        return pad_lanes(jnp.asarray(v, jnp.float32).reshape(1, -1))

    rows = [vec_row(raw["emb_ln_g"]), vec_row(raw["emb_ln_b"]), vec_row(raw["cls_b"])]
    for lp in L:
        rows.extend([
            vec_row(jnp.concatenate([lp["bq"] * scale, lp["bk"], lp["bv"]], axis=1)),
            vec_row(lp["bo"]),
            vec_row(lp["ln1_g"]), vec_row(lp["ln1_b"]),
            vec_row(lp["b1"]), vec_row(lp["b2"]),
            vec_row(lp["ln2_g"]), vec_row(lp["ln2_b"]),
        ])
    vecs = jnp.concatenate(rows, axis=0)                     # (19, 128)
    vecs = jnp.pad(vecs, ((0, N_VEC_ROWS - vecs.shape[0]), (0, 0)))

    return {
        "word_emb": raw["word_emb"], "pos_emb": raw["pos_emb"],
        "vecs": vecs, "wqkv": wqkv, "wo": wo, "w1": w1, "w2": w2,
        "cls_w_pad": pad_lanes(raw["cls_w"]),                # (H, 128)
    }


# ---------------- pure-JAX reference (same math, unpacked weights) ----------------
def reference_forward(raw, input_ids, attention_mask):
    def ln(x, g, b):
        mu = x.mean(-1, keepdims=True)
        var = ((x - mu) ** 2).mean(-1, keepdims=True)
        return (x - mu) / jnp.sqrt(var + LN_EPS) * g + b

    pos = raw["pos_emb"][:S]
    h = ln(raw["word_emb"][input_ids] + pos[None], raw["emb_ln_g"], raw["emb_ln_b"])
    am = attention_mask.astype(jnp.float32)
    mask = jnp.where(am[:, None, None, :] > 0.0, 0.0, MASK_NEG)            # (B,1,1,S)
    scale = 1.0 / math.sqrt(HEAD_DIM)
    for lp in raw["layers"]:
        x = h
        q = x @ lp["wq"] + lp["bq"]
        k = x @ lp["wk"] + lp["bk"]
        v = x @ lp["wv"] + lp["bv"]
        split = lambda t: t.reshape(B, S, N_HEADS, HEAD_DIM).transpose(0, 2, 1, 3)
        q, k, v = split(q), split(k), split(v)
        s = (q * scale) @ k.transpose(0, 1, 3, 2) + mask
        p = jax.nn.softmax(s, axis=-1)
        ctx = (p @ v).transpose(0, 2, 1, 3).reshape(B, S, HIDDEN)
        h1 = ln(ctx @ lp["wo"] + lp["bo"] + x, lp["ln1_g"], lp["ln1_b"])
        f = h1 @ lp["w1"] + lp["b1"]
        f = 0.5 * f * (1.0 + jnp.tanh(0.7978845608028654 * (f + 0.044715 * f ** 3)))
        f = f @ lp["w2"] + lp["b2"]
        h = ln(f + h1, lp["ln2_g"], lp["ln2_b"])
    return h[:, 0] @ raw["cls_w"] + raw["cls_b"]


if __name__ == "__main__":
    key = jax.random.PRNGKey(0)
    pkey, ikey = jax.random.split(key)
    raw = init_params(pkey)
    params = pack_params(raw)

    input_ids = jax.random.randint(ikey, (B, S), 0, VOCAB, dtype=jnp.int32)
    attention_mask = jnp.ones((B, S), jnp.int32).at[1, 6:].set(0)   # pad tail of 2nd example

    logits = jax.jit(life_advisor_forward)(params, input_ids, attention_mask)
    logits = jax.block_until_ready(logits)

    ref = reference_forward(raw, input_ids, attention_mask)
    assert logits.shape == (B, NUM_LABELS) and logits.dtype == jnp.float32
    assert bool(jnp.all(jnp.isfinite(logits)))
    assert bool(jnp.allclose(logits, ref, atol=1e-2, rtol=1e-2))
    print("KERNEL_OK")
</pallas_src>

<mosaic_0001>
module attributes {stable_mosaic.version = 11 : i64} {
  func.func @fused_model_kernel(%arg0: memref<16x32xf32, #tpu.memory_space<vmem>>, %arg1: memref<16x16xf32, #tpu.memory_space<vmem>>, %arg2: memref<24x128xf32, #tpu.memory_space<vmem>>, %arg3: memref<2x32x128xf32, #tpu.memory_space<vmem>>, %arg4: memref<2x32x32xf32, #tpu.memory_space<vmem>>, %arg5: memref<2x32x128xf32, #tpu.memory_space<vmem>>, %arg6: memref<2x128x32xf32, #tpu.memory_space<vmem>>, %arg7: memref<32x128xf32, #tpu.memory_space<vmem>>, %arg8: memref<16x128xf32, #tpu.memory_space<vmem>>) attributes {dimension_semantics = [], scalar_prefetch = 0 : i64, scratch_operands = 0 : i64, tpu.core_type = #tpu.core_type<tc>} {
    %c0 = arith.constant 0 : index
    %c0_0 = arith.constant 0 : index
    %0 = vector.load %arg2[%c0, %c0_0] : memref<24x128xf32, #tpu.memory_space<vmem>>, vector<24x128xf32>
    %c0_1 = arith.constant 0 : index
    %c0_2 = arith.constant 0 : index
    %1 = vector.load %arg1[%c0_1, %c0_2] : memref<16x16xf32, #tpu.memory_space<vmem>>, vector<16x16xf32>
    %c0_3 = arith.constant 0 : index
    %c0_4 = arith.constant 0 : index
    %2 = vector.load %arg0[%c0_3, %c0_4] : memref<16x32xf32, #tpu.memory_space<vmem>>, vector<16x32xf32>
    %3 = vector.extract_strided_slice %0 {offsets = [0, 0], sizes = [1, 32], strides = [1, 1]} : vector<24x128xf32> to vector<1x32xf32>
    %4 = vector.extract_strided_slice %0 {offsets = [1, 0], sizes = [1, 32], strides = [1, 1]} : vector<24x128xf32> to vector<1x32xf32>
    %cst = arith.constant dense<0.000000e+00> : vector<16xf32>
    %5 = vector.multi_reduction <add>, %2, %cst [1] : vector<16x32xf32> to vector<16xf32>
    %6 = vector.shape_cast %5 : vector<16xf32> to vector<16x1xf32>
    %cst_5 = arith.constant 3.200000e+01 : f32
    %7 = vector.broadcast %cst_5 : f32 to vector<16x1xf32>
    %8 = arith.divf %6, %7 : vector<16x1xf32>
    %9 = vector.broadcast %8 : vector<16x1xf32> to vector<16x32xf32>
    %10 = arith.subf %2, %9 : vector<16x32xf32>
    %11 = arith.mulf %10, %10 : vector<16x32xf32>
    %cst_6 = arith.constant dense<0.000000e+00> : vector<16xf32>
    %12 = vector.multi_reduction <add>, %11, %cst_6 [1] : vector<16x32xf32> to vector<16xf32>
    %13 = vector.shape_cast %12 : vector<16xf32> to vector<16x1xf32>
    %cst_7 = arith.constant 3.200000e+01 : f32
    %14 = vector.broadcast %cst_7 : f32 to vector<16x1xf32>
    %15 = arith.divf %13, %14 : vector<16x1xf32>
    %16 = vector.broadcast %8 : vector<16x1xf32> to vector<16x32xf32>
    %17 = arith.subf %2, %16 : vector<16x32xf32>
    %cst_8 = arith.constant 9.99999996E-13 : f32
    %18 = vector.broadcast %cst_8 : f32 to vector<16x1xf32>
    %19 = arith.addf %15, %18 : vector<16x1xf32>
    %20 = math.rsqrt %19 : vector<16x1xf32>
    %21 = vector.broadcast %20 : vector<16x1xf32> to vector<16x32xf32>
    %22 = arith.mulf %17, %21 : vector<16x32xf32>
    %23 = vector.broadcast %3 : vector<1x32xf32> to vector<16x32xf32>
    %24 = arith.mulf %22, %23 : vector<16x32xf32>
    %25 = vector.broadcast %4 : vector<1x32xf32> to vector<16x32xf32>
    %26 = arith.addf %24, %25 : vector<16x32xf32>
    %c0_9 = arith.constant 0 : index
    %c0_10 = arith.constant 0 : index
    %c0_11 = arith.constant 0 : index
    %27 = vector.load %arg3[%c0_9, %c0_10, %c0_11] : memref<2x32x128xf32, #tpu.memory_space<vmem>>, vector<1x32x128xf32>
    %28 = vector.shape_cast %27 : vector<1x32x128xf32> to vector<32x128xf32>
    %cst_12 = arith.constant dense<0.000000e+00> : vector<16x128xf32>
    %29 = tpu.matmul %26, %28, %cst_12 {dimension_numbers = #tpu.dot_dimension_numbers<[1], [0], [0], [1], [0, 0, 1, 1], [], []>} : vector<16x32xf32>, vector<32x128xf32>, vector<16x128xf32> -> vector<16x128xf32>
    %30 = vector.extract_strided_slice %0 {offsets = [3, 0], sizes = [1, 128], strides = [1, 1]} : vector<24x128xf32> to vector<1x128xf32>
    %31 = vector.broadcast %30 : vector<1x128xf32> to vector<16x128xf32>
    %32 = arith.addf %29, %31 : vector<16x128xf32>
    %33 = vector.extract_strided_slice %32 {offsets = [0, 0], sizes = [16, 8], strides = [1, 1]} : vector<16x128xf32> to vector<16x8xf32>
    %34 = vector.extract_strided_slice %32 {offsets = [0, 32], sizes = [16, 8], strides = [1, 1]} : vector<16x128xf32> to vector<16x8xf32>
    %35 = vector.extract_strided_slice %32 {offsets = [0, 64], sizes = [16, 8], strides = [1, 1]} : vector<16x128xf32> to vector<16x8xf32>
    %cst_13 = arith.constant dense<0.000000e+00> : vector<16x16xf32>
    %36 = tpu.matmul %33, %34, %cst_13 {dimension_numbers = #tpu.dot_dimension_numbers<[1], [1], [0], [0], [0, 0, 1, 0], [], []>} : vector<16x8xf32>, vector<16x8xf32>, vector<16x16xf32> -> vector<16x16xf32>
    %37 = arith.addf %36, %1 : vector<16x16xf32>
    %cst_14 = arith.constant dense<0xFF800000> : vector<16xf32>
    %38 = vector.multi_reduction <maximumf>, %37, %cst_14 [1] : vector<16x16xf32> to vector<16xf32>
    %39 = vector.shape_cast %38 : vector<16xf32> to vector<16x1xf32>
    %40 = vector.broadcast %39 : vector<16x1xf32> to vector<16x16xf32>
    %41 = arith.subf %37, %40 : vector<16x16xf32>
    %42 = math.exp %41 : vector<16x16xf32>
    %cst_15 = arith.constant dense<0.000000e+00> : vector<16xf32>
    %43 = vector.multi_reduction <add>, %42, %cst_15 [1] : vector<16x16xf32> to vector<16xf32>
    %44 = vector.shape_cast %43 : vector<16xf32> to vector<16x1xf32>
    %45 = tpu.reciprocal %44 {approx = true} : vector<16x1xf32> -> vector<16x1xf32>
    %46 = vector.broadcast %45 : vector<16x1xf32> to vector<16x16xf32>
    %47 = arith.mulf %42, %46 : vector<16x16xf32>
    %cst_16 = arith.constant dense<0.000000e+00> : vector<16x8xf32>
    %48 = tpu.matmul %47, %35, %cst_16 {dimension_numbers = #tpu.dot_dimension_numbers<[1], [0], [0], [1], [0, 0, 1, 1], [], []>} : vector<16x16xf32>, vector<16x8xf32>, vector<16x8xf32> -> vector<16x8xf32>
    %49 = vector.extract_strided_slice %32 {offsets = [0, 8], sizes = [16, 8], strides = [1, 1]} : vector<16x128xf32> to vector<16x8xf32>
    %50 = vector.extract_strided_slice %32 {offsets = [0, 40], sizes = [16, 8], strides = [1, 1]} : vector<16x128xf32> to vector<16x8xf32>
    %51 = vector.extract_strided_slice %32 {offsets = [0, 72], sizes = [16, 8], strides = [1, 1]} : vector<16x128xf32> to vector<16x8xf32>
    %cst_17 = arith.constant dense<0.000000e+00> : vector<16x16xf32>
    %52 = tpu.matmul %49, %50, %cst_17 {dimension_numbers = #tpu.dot_dimension_numbers<[1], [1], [0], [0], [0, 0, 1, 0], [], []>} : vector<16x8xf32>, vector<16x8xf32>, vector<16x16xf32> -> vector<16x16xf32>
    %53 = arith.addf %52, %1 : vector<16x16xf32>
    %cst_18 = arith.constant dense<0xFF800000> : vector<16xf32>
    %54 = vector.multi_reduction <maximumf>, %53, %cst_18 [1] : vector<16x16xf32> to vector<16xf32>
    %55 = vector.shape_cast %54 : vector<16xf32> to vector<16x1xf32>
    %56 = vector.broadcast %55 : vector<16x1xf32> to vector<16x16xf32>
    %57 = arith.subf %53, %56 : vector<16x16xf32>
    %58 = math.exp %57 : vector<16x16xf32>
    %cst_19 = arith.constant dense<0.000000e+00> : vector<16xf32>
    %59 = vector.multi_reduction <add>, %58, %cst_19 [1] : vector<16x16xf32> to vector<16xf32>
    %60 = vector.shape_cast %59 : vector<16xf32> to vector<16x1xf32>
    %61 = tpu.reciprocal %60 {approx = true} : vector<16x1xf32> -> vector<16x1xf32>
    %62 = vector.broadcast %61 : vector<16x1xf32> to vector<16x16xf32>
    %63 = arith.mulf %58, %62 : vector<16x16xf32>
    %cst_20 = arith.constant dense<0.000000e+00> : vector<16x8xf32>
    %64 = tpu.matmul %63, %51, %cst_20 {dimension_numbers = #tpu.dot_dimension_numbers<[1], [0], [0], [1], [0, 0, 1, 1], [], []>} : vector<16x16xf32>, vector<16x8xf32>, vector<16x8xf32> -> vector<16x8xf32>
    %65 = vector.extract_strided_slice %32 {offsets = [0, 16], sizes = [16, 8], strides = [1, 1]} : vector<16x128xf32> to vector<16x8xf32>
    %66 = vector.extract_strided_slice %32 {offsets = [0, 48], sizes = [16, 8], strides = [1, 1]} : vector<16x128xf32> to vector<16x8xf32>
    %67 = vector.extract_strided_slice %32 {offsets = [0, 80], sizes = [16, 8], strides = [1, 1]} : vector<16x128xf32> to vector<16x8xf32>
    %cst_21 = arith.constant dense<0.000000e+00> : vector<16x16xf32>
    %68 = tpu.matmul %65, %66, %cst_21 {dimension_numbers = #tpu.dot_dimension_numbers<[1], [1], [0], [0], [0, 0, 1, 0], [], []>} : vector<16x8xf32>, vector<16x8xf32>, vector<16x16xf32> -> vector<16x16xf32>
    %69 = arith.addf %68, %1 : vector<16x16xf32>
    %cst_22 = arith.constant dense<0xFF800000> : vector<16xf32>
    %70 = vector.multi_reduction <maximumf>, %69, %cst_22 [1] : vector<16x16xf32> to vector<16xf32>
    %71 = vector.shape_cast %70 : vector<16xf32> to vector<16x1xf32>
    %72 = vector.broadcast %71 : vector<16x1xf32> to vector<16x16xf32>
    %73 = arith.subf %69, %72 : vector<16x16xf32>
    %74 = math.exp %73 : vector<16x16xf32>
    %cst_23 = arith.constant dense<0.000000e+00> : vector<16xf32>
    %75 = vector.multi_reduction <add>, %74, %cst_23 [1] : vector<16x16xf32> to vector<16xf32>
    %76 = vector.shape_cast %75 : vector<16xf32> to vector<16x1xf32>
    %77 = tpu.reciprocal %76 {approx = true} : vector<16x1xf32> -> vector<16x1xf32>
    %78 = vector.broadcast %77 : vector<16x1xf32> to vector<16x16xf32>
    %79 = arith.mulf %74, %78 : vector<16x16xf32>
    %cst_24 = arith.constant dense<0.000000e+00> : vector<16x8xf32>
    %80 = tpu.matmul %79, %67, %cst_24 {dimension_numbers = #tpu.dot_dimension_numbers<[1], [0], [0], [1], [0, 0, 1, 1], [], []>} : vector<16x16xf32>, vector<16x8xf32>, vector<16x8xf32> -> vector<16x8xf32>
    %81 = vector.extract_strided_slice %32 {offsets = [0, 24], sizes = [16, 8], strides = [1, 1]} : vector<16x128xf32> to vector<16x8xf32>
    %82 = vector.extract_strided_slice %32 {offsets = [0, 56], sizes = [16, 8], strides = [1, 1]} : vector<16x128xf32> to vector<16x8xf32>
    %83 = vector.extract_strided_slice %32 {offsets = [0, 88], sizes = [16, 8], strides = [1, 1]} : vector<16x128xf32> to vector<16x8xf32>
    %cst_25 = arith.constant dense<0.000000e+00> : vector<16x16xf32>
    %84 = tpu.matmul %81, %82, %cst_25 {dimension_numbers = #tpu.dot_dimension_numbers<[1], [1], [0], [0], [0, 0, 1, 0], [], []>} : vector<16x8xf32>, vector<16x8xf32>, vector<16x16xf32> -> vector<16x16xf32>
    %85 = arith.addf %84, %1 : vector<16x16xf32>
    %cst_26 = arith.constant dense<0xFF800000> : vector<16xf32>
    %86 = vector.multi_reduction <maximumf>, %85, %cst_26 [1] : vector<16x16xf32> to vector<16xf32>
    %87 = vector.shape_cast %86 : vector<16xf32> to vector<16x1xf32>
    %88 = vector.broadcast %87 : vector<16x1xf32> to vector<16x16xf32>
    %89 = arith.subf %85, %88 : vector<16x16xf32>
    %90 = math.exp %89 : vector<16x16xf32>
    %cst_27 = arith.constant dense<0.000000e+00> : vector<16xf32>
    %91 = vector.multi_reduction <add>, %90, %cst_27 [1] : vector<16x16xf32> to vector<16xf32>
    %92 = vector.shape_cast %91 : vector<16xf32> to vector<16x1xf32>
    %93 = tpu.reciprocal %92 {approx = true} : vector<16x1xf32> -> vector<16x1xf32>
    %94 = vector.broadcast %93 : vector<16x1xf32> to vector<16x16xf32>
    %95 = arith.mulf %90, %94 : vector<16x16xf32>
    %cst_28 = arith.constant dense<0.000000e+00> : vector<16x8xf32>
    %96 = tpu.matmul %95, %83, %cst_28 {dimension_numbers = #tpu.dot_dimension_numbers<[1], [0], [0], [1], [0, 0, 1, 1], [], []>} : vector<16x16xf32>, vector<16x8xf32>, vector<16x8xf32> -> vector<16x8xf32>
    %97 = tpu.concatenate %48, %64, %80, %96 in 1 : vector<16x8xf32>, vector<16x8xf32>, vector<16x8xf32>, vector<16x8xf32> -> vector<16x32xf32>
    %c0_29 = arith.constant 0 : index
    %c0_30 = arith.constant 0 : index
    %c0_31 = arith.constant 0 : index
    %98 = vector.load %arg4[%c0_29, %c0_30, %c0_31] : memref<2x32x32xf32, #tpu.memory_space<vmem>>, vector<1x32x32xf32>
    %99 = vector.shape_cast %98 : vector<1x32x32xf32> to vector<32x32xf32>
    %cst_32 = arith.constant dense<0.000000e+00> : vector<16x32xf32>
    %100 = tpu.matmul %97, %99, %cst_32 {dimension_numbers = #tpu.dot_dimension_numbers<[1], [0], [0], [1], [0, 0, 1, 1], [], []>} : vector<16x32xf32>, vector<32x32xf32>, vector<16x32xf32> -> vector<16x32xf32>
    %101 = vector.extract_strided_slice %0 {offsets = [4, 0], sizes = [1, 32], strides = [1, 1]} : vector<24x128xf32> to vector<1x32xf32>
    %102 = vector.broadcast %101 : vector<1x32xf32> to vector<16x32xf32>
    %103 = arith.addf %100, %102 : vector<16x32xf32>
    %104 = arith.addf %103, %26 : vector<16x32xf32>
    %105 = vector.extract_strided_slice %0 {offsets = [5, 0], sizes = [1, 32], strides = [1, 1]} : vector<24x128xf32> to vector<1x32xf32>
    %106 = vector.extract_strided_slice %0 {offsets = [6, 0], sizes = [1, 32], strides = [1, 1]} : vector<24x128xf32> to vector<1x32xf32>
    %cst_33 = arith.constant dense<0.000000e+00> : vector<16xf32>
    %107 = vector.multi_reduction <add>, %104, %cst_33 [1] : vector<16x32xf32> to vector<16xf32>
    %108 = vector.shape_cast %107 : vector<16xf32> to vector<16x1xf32>
    %cst_34 = arith.constant 3.200000e+01 : f32
    %109 = vector.broadcast %cst_34 : f32 to vector<16x1xf32>
    %110 = arith.divf %108, %109 : vector<16x1xf32>
    %111 = vector.broadcast %110 : vector<16x1xf32> to vector<16x32xf32>
    %112 = arith.subf %104, %111 : vector<16x32xf32>
    %113 = arith.mulf %112, %112 : vector<16x32xf32>
    %cst_35 = arith.constant dense<0.000000e+00> : vector<16xf32>
    %114 = vector.multi_reduction <add>, %113, %cst_35 [1] : vector<16x32xf32> to vector<16xf32>
    %115 = vector.shape_cast %114 : vector<16xf32> to vector<16x1xf32>
    %cst_36 = arith.constant 3.200000e+01 : f32
    %116 = vector.broadcast %cst_36 : f32 to vector<16x1xf32>
    %117 = arith.divf %115, %116 : vector<16x1xf32>
    %118 = vector.broadcast %110 : vector<16x1xf32> to vector<16x32xf32>
    %119 = arith.subf %104, %118 : vector<16x32xf32>
    %cst_37 = arith.constant 9.99999996E-13 : f32
    %120 = vector.broadcast %cst_37 : f32 to vector<16x1xf32>
    %121 = arith.addf %117, %120 : vector<16x1xf32>
    %122 = math.rsqrt %121 : vector<16x1xf32>
    %123 = vector.broadcast %122 : vector<16x1xf32> to vector<16x32xf32>
    %124 = arith.mulf %119, %123 : vector<16x32xf32>
    %125 = vector.broadcast %105 : vector<1x32xf32> to vector<16x32xf32>
    %126 = arith.mulf %124, %125 : vector<16x32xf32>
    %127 = vector.broadcast %106 : vector<1x32xf32> to vector<16x32xf32>
    %128 = arith.addf %126, %127 : vector<16x32xf32>
    %c0_38 = arith.constant 0 : index
    %c0_39 = arith.constant 0 : index
    %c0_40 = arith.constant 0 : index
    %129 = vector.load %arg5[%c0_38, %c0_39, %c0_40] : memref<2x32x128xf32, #tpu.memory_space<vmem>>, vector<1x32x128xf32>
    %130 = vector.shape_cast %129 : vector<1x32x128xf32> to vector<32x128xf32>
    %cst_41 = arith.constant dense<0.000000e+00> : vector<16x128xf32>
    %131 = tpu.matmul %128, %130, %cst_41 {dimension_numbers = #tpu.dot_dimension_numbers<[1], [0], [0], [1], [0, 0, 1, 1], [], []>} : vector<16x32xf32>, vector<32x128xf32>, vector<16x128xf32> -> vector<16x128xf32>
    %132 = vector.extract_strided_slice %0 {offsets = [7, 0], sizes = [1, 128], strides = [1, 1]} : vector<24x128xf32> to vector<1x128xf32>
    %133 = vector.broadcast %132 : vector<1x128xf32> to vector<16x128xf32>
    %134 = arith.addf %131, %133 : vector<16x128xf32>
    %cst_42 = arith.constant 5.000000e-01 : f32
    %135 = vector.broadcast %cst_42 : f32 to vector<16x128xf32>
    %136 = arith.mulf %135, %134 : vector<16x128xf32>
    %cst_43 = arith.constant 4.471500e-02 : f32
    %137 = vector.broadcast %cst_43 : f32 to vector<16x128xf32>
    %138 = arith.mulf %137, %134 : vector<16x128xf32>
    %139 = arith.mulf %138, %134 : vector<16x128xf32>
    %140 = arith.mulf %139, %134 : vector<16x128xf32>
    %141 = arith.addf %134, %140 : vector<16x128xf32>
    %cst_44 = arith.constant 0.797884583 : f32
    %142 = vector.broadcast %cst_44 : f32 to vector<16x128xf32>
    %143 = arith.mulf %142, %141 : vector<16x128xf32>
    %144 = math.tanh %143 : vector<16x128xf32>
    %cst_45 = arith.constant 1.000000e+00 : f32
    %145 = vector.broadcast %cst_45 : f32 to vector<16x128xf32>
    %146 = arith.addf %145, %144 : vector<16x128xf32>
    %147 = arith.mulf %136, %146 : vector<16x128xf32>
    %c0_46 = arith.constant 0 : index
    %c0_47 = arith.constant 0 : index
    %c0_48 = arith.constant 0 : index
    %148 = vector.load %arg6[%c0_46, %c0_47, %c0_48] : memref<2x128x32xf32, #tpu.memory_space<vmem>>, vector<1x128x32xf32>
    %149 = vector.shape_cast %148 : vector<1x128x32xf32> to vector<128x32xf32>
    %cst_49 = arith.constant dense<0.000000e+00> : vector<16x32xf32>
    %150 = tpu.matmul %147, %149, %cst_49 {dimension_numbers = #tpu.dot_dimension_numbers<[1], [0], [0], [1], [0, 0, 1, 1], [], []>} : vector<16x128xf32>, vector<128x32xf32>, vector<16x32xf32> -> vector<16x32xf32>
    %151 = vector.extract_strided_slice %0 {offsets = [8, 0], sizes = [1, 32], strides = [1, 1]} : vector<24x128xf32> to vector<1x32xf32>
    %152 = vector.broadcast %151 : vector<1x32xf32> to vector<16x32xf32>
    %153 = arith.addf %150, %152 : vector<16x32xf32>
    %154 = arith.addf %153, %128 : vector<16x32xf32>
    %155 = vector.extract_strided_slice %0 {offsets = [9, 0], sizes = [1, 32], strides = [1, 1]} : vector<24x128xf32> to vector<1x32xf32>
    %156 = vector.extract_strided_slice %0 {offsets = [10, 0], sizes = [1, 32], strides = [1, 1]} : vector<24x128xf32> to vector<1x32xf32>
    %cst_50 = arith.constant dense<0.000000e+00> : vector<16xf32>
    %157 = vector.multi_reduction <add>, %154, %cst_50 [1] : vector<16x32xf32> to vector<16xf32>
    %158 = vector.shape_cast %157 : vector<16xf32> to vector<16x1xf32>
    %cst_51 = arith.constant 3.200000e+01 : f32
    %159 = vector.broadcast %cst_51 : f32 to vector<16x1xf32>
    %160 = arith.divf %158, %159 : vector<16x1xf32>
    %161 = vector.broadcast %160 : vector<16x1xf32> to vector<16x32xf32>
    %162 = arith.subf %154, %161 : vector<16x32xf32>
    %163 = arith.mulf %162, %162 : vector<16x32xf32>
    %cst_52 = arith.constant dense<0.000000e+00> : vector<16xf32>
    %164 = vector.multi_reduction <add>, %163, %cst_52 [1] : vector<16x32xf32> to vector<16xf32>
    %165 = vector.shape_cast %164 : vector<16xf32> to vector<16x1xf32>
    %cst_53 = arith.constant 3.200000e+01 : f32
    %166 = vector.broadcast %cst_53 : f32 to vector<16x1xf32>
    %167 = arith.divf %165, %166 : vector<16x1xf32>
    %168 = vector.broadcast %160 : vector<16x1xf32> to vector<16x32xf32>
    %169 = arith.subf %154, %168 : vector<16x32xf32>
    %cst_54 = arith.constant 9.99999996E-13 : f32
    %170 = vector.broadcast %cst_54 : f32 to vector<16x1xf32>
    %171 = arith.addf %167, %170 : vector<16x1xf32>
    %172 = math.rsqrt %171 : vector<16x1xf32>
    %173 = vector.broadcast %172 : vector<16x1xf32> to vector<16x32xf32>
    %174 = arith.mulf %169, %173 : vector<16x32xf32>
    %175 = vector.broadcast %155 : vector<1x32xf32> to vector<16x32xf32>
    %176 = arith.mulf %174, %175 : vector<16x32xf32>
    %177 = vector.broadcast %156 : vector<1x32xf32> to vector<16x32xf32>
    %178 = arith.addf %176, %177 : vector<16x32xf32>
    %c1 = arith.constant 1 : index
    %c0_55 = arith.constant 0 : index
    %c0_56 = arith.constant 0 : index
    %179 = vector.load %arg3[%c1, %c0_55, %c0_56] : memref<2x32x128xf32, #tpu.memory_space<vmem>>, vector<1x32x128xf32>
    %180 = vector.shape_cast %179 : vector<1x32x128xf32> to vector<32x128xf32>
    %cst_57 = arith.constant dense<0.000000e+00> : vector<16x128xf32>
    %181 = tpu.matmul %178, %180, %cst_57 {dimension_numbers = #tpu.dot_dimension_numbers<[1], [0], [0], [1], [0, 0, 1, 1], [], []>} : vector<16x32xf32>, vector<32x128xf32>, vector<16x128xf32> -> vector<16x128xf32>
    %182 = vector.extract_strided_slice %0 {offsets = [11, 0], sizes = [1, 128], strides = [1, 1]} : vector<24x128xf32> to vector<1x128xf32>
    %183 = vector.broadcast %182 : vector<1x128xf32> to vector<16x128xf32>
    %184 = arith.addf %181, %183 : vector<16x128xf32>
    %185 = vector.extract_strided_slice %184 {offsets = [0, 0], sizes = [16, 8], strides = [1, 1]} : vector<16x128xf32> to vector<16x8xf32>
    %186 = vector.extract_strided_slice %184 {offsets = [0, 32], sizes = [16, 8], strides = [1, 1]} : vector<16x128xf32> to vector<16x8xf32>
    %187 = vector.extract_strided_slice %184 {offsets = [0, 64], sizes = [16, 8], strides = [1, 1]} : vector<16x128xf32> to vector<16x8xf32>
    %cst_58 = arith.constant dense<0.000000e+00> : vector<16x16xf32>
    %188 = tpu.matmul %185, %186, %cst_58 {dimension_numbers = #tpu.dot_dimension_numbers<[1], [1], [0], [0], [0, 0, 1, 0], [], []>} : vector<16x8xf32>, vector<16x8xf32>, vector<16x16xf32> -> vector<16x16xf32>
    %189 = arith.addf %188, %1 : vector<16x16xf32>
    %cst_59 = arith.constant dense<0xFF800000> : vector<16xf32>
    %190 = vector.multi_reduction <maximumf>, %189, %cst_59 [1] : vector<16x16xf32> to vector<16xf32>
    %191 = vector.shape_cast %190 : vector<16xf32> to vector<16x1xf32>
    %192 = vector.broadcast %191 : vector<16x1xf32> to vector<16x16xf32>
    %193 = arith.subf %189, %192 : vector<16x16xf32>
    %194 = math.exp %193 : vector<16x16xf32>
    %cst_60 = arith.constant dense<0.000000e+00> : vector<16xf32>
    %195 = vector.multi_reduction <add>, %194, %cst_60 [1] : vector<16x16xf32> to vector<16xf32>
    %196 = vector.shape_cast %195 : vector<16xf32> to vector<16x1xf32>
    %197 = tpu.reciprocal %196 {approx = true} : vector<16x1xf32> -> vector<16x1xf32>
    %198 = vector.broadcast %197 : vector<16x1xf32> to vector<16x16xf32>
    %199 = arith.mulf %194, %198 : vector<16x16xf32>
    %cst_61 = arith.constant dense<0.000000e+00> : vector<16x8xf32>
    %200 = tpu.matmul %199, %187, %cst_61 {dimension_numbers = #tpu.dot_dimension_numbers<[1], [0], [0], [1], [0, 0, 1, 1], [], []>} : vector<16x16xf32>, vector<16x8xf32>, vector<16x8xf32> -> vector<16x8xf32>
    %201 = vector.extract_strided_slice %184 {offsets = [0, 8], sizes = [16, 8], strides = [1, 1]} : vector<16x128xf32> to vector<16x8xf32>
    %202 = vector.extract_strided_slice %184 {offsets = [0, 40], sizes = [16, 8], strides = [1, 1]} : vector<16x128xf32> to vector<16x8xf32>
    %203 = vector.extract_strided_slice %184 {offsets = [0, 72], sizes = [16, 8], strides = [1, 1]} : vector<16x128xf32> to vector<16x8xf32>
    %cst_62 = arith.constant dense<0.000000e+00> : vector<16x16xf32>
    %204 = tpu.matmul %201, %202, %cst_62 {dimension_numbers = #tpu.dot_dimension_numbers<[1], [1], [0], [0], [0, 0, 1, 0], [], []>} : vector<16x8xf32>, vector<16x8xf32>, vector<16x16xf32> -> vector<16x16xf32>
    %205 = arith.addf %204, %1 : vector<16x16xf32>
    %cst_63 = arith.constant dense<0xFF800000> : vector<16xf32>
    %206 = vector.multi_reduction <maximumf>, %205, %cst_63 [1] : vector<16x16xf32> to vector<16xf32>
    %207 = vector.shape_cast %206 : vector<16xf32> to vector<16x1xf32>
    %208 = vector.broadcast %207 : vector<16x1xf32> to vector<16x16xf32>
    %209 = arith.subf %205, %208 : vector<16x16xf32>
    %210 = math.exp %209 : vector<16x16xf32>
    %cst_64 = arith.constant dense<0.000000e+00> : vector<16xf32>
    %211 = vector.multi_reduction <add>, %210, %cst_64 [1] : vector<16x16xf32> to vector<16xf32>
    %212 = vector.shape_cast %211 : vector<16xf32> to vector<16x1xf32>
    %213 = tpu.reciprocal %212 {approx = true} : vector<16x1xf32> -> vector<16x1xf32>
    %214 = vector.broadcast %213 : vector<16x1xf32> to vector<16x16xf32>
    %215 = arith.mulf %210, %214 : vector<16x16xf32>
    %cst_65 = arith.constant dense<0.000000e+00> : vector<16x8xf32>
    %216 = tpu.matmul %215, %203, %cst_65 {dimension_numbers = #tpu.dot_dimension_numbers<[1], [0], [0], [1], [0, 0, 1, 1], [], []>} : vector<16x16xf32>, vector<16x8xf32>, vector<16x8xf32> -> vector<16x8xf32>
    %217 = vector.extract_strided_slice %184 {offsets = [0, 16], sizes = [16, 8], strides = [1, 1]} : vector<16x128xf32> to vector<16x8xf32>
    %218 = vector.extract_strided_slice %184 {offsets = [0, 48], sizes = [16, 8], strides = [1, 1]} : vector<16x128xf32> to vector<16x8xf32>
    %219 = vector.extract_strided_slice %184 {offsets = [0, 80], sizes = [16, 8], strides = [1, 1]} : vector<16x128xf32> to vector<16x8xf32>
    %cst_66 = arith.constant dense<0.000000e+00> : vector<16x16xf32>
    %220 = tpu.matmul %217, %218, %cst_66 {dimension_numbers = #tpu.dot_dimension_numbers<[1], [1], [0], [0], [0, 0, 1, 0], [], []>} : vector<16x8xf32>, vector<16x8xf32>, vector<16x16xf32> -> vector<16x16xf32>
    %221 = arith.addf %220, %1 : vector<16x16xf32>
    %cst_67 = arith.constant dense<0xFF800000> : vector<16xf32>
    %222 = vector.multi_reduction <maximumf>, %221, %cst_67 [1] : vector<16x16xf32> to vector<16xf32>
    %223 = vector.shape_cast %222 : vector<16xf32> to vector<16x1xf32>
    %224 = vector.broadcast %223 : vector<16x1xf32> to vector<16x16xf32>
    %225 = arith.subf %221, %224 : vector<16x16xf32>
    %226 = math.exp %225 : vector<16x16xf32>
    %cst_68 = arith.constant dense<0.000000e+00> : vector<16xf32>
    %227 = vector.multi_reduction <add>, %226, %cst_68 [1] : vector<16x16xf32> to vector<16xf32>
    %228 = vector.shape_cast %227 : vector<16xf32> to vector<16x1xf32>
    %229 = tpu.reciprocal %228 {approx = true} : vector<16x1xf32> -> vector<16x1xf32>
    %230 = vector.broadcast %229 : vector<16x1xf32> to vector<16x16xf32>
    %231 = arith.mulf %226, %230 : vector<16x16xf32>
    %cst_69 = arith.constant dense<0.000000e+00> : vector<16x8xf32>
    %232 = tpu.matmul %231, %219, %cst_69 {dimension_numbers = #tpu.dot_dimension_numbers<[1], [0], [0], [1], [0, 0, 1, 1], [], []>} : vector<16x16xf32>, vector<16x8xf32>, vector<16x8xf32> -> vector<16x8xf32>
    %233 = vector.extract_strided_slice %184 {offsets = [0, 24], sizes = [16, 8], strides = [1, 1]} : vector<16x128xf32> to vector<16x8xf32>
    %234 = vector.extract_strided_slice %184 {offsets = [0, 56], sizes = [16, 8], strides = [1, 1]} : vector<16x128xf32> to vector<16x8xf32>
    %235 = vector.extract_strided_slice %184 {offsets = [0, 88], sizes = [16, 8], strides = [1, 1]} : vector<16x128xf32> to vector<16x8xf32>
    %cst_70 = arith.constant dense<0.000000e+00> : vector<16x16xf32>
    %236 = tpu.matmul %233, %234, %cst_70 {dimension_numbers = #tpu.dot_dimension_numbers<[1], [1], [0], [0], [0, 0, 1, 0], [], []>} : vector<16x8xf32>, vector<16x8xf32>, vector<16x16xf32> -> vector<16x16xf32>
    %237 = arith.addf %236, %1 : vector<16x16xf32>
    %cst_71 = arith.constant dense<0xFF800000> : vector<16xf32>
    %238 = vector.multi_reduction <maximumf>, %237, %cst_71 [1] : vector<16x16xf32> to vector<16xf32>
    %239 = vector.shape_cast %238 : vector<16xf32> to vector<16x1xf32>
    %240 = vector.broadcast %239 : vector<16x1xf32> to vector<16x16xf32>
    %241 = arith.subf %237, %240 : vector<16x16xf32>
    %242 = math.exp %241 : vector<16x16xf32>
    %cst_72 = arith.constant dense<0.000000e+00> : vector<16xf32>
    %243 = vector.multi_reduction <add>, %242, %cst_72 [1] : vector<16x16xf32> to vector<16xf32>
    %244 = vector.shape_cast %243 : vector<16xf32> to vector<16x1xf32>
    %245 = tpu.reciprocal %244 {approx = true} : vector<16x1xf32> -> vector<16x1xf32>
    %246 = vector.broadcast %245 : vector<16x1xf32> to vector<16x16xf32>
    %247 = arith.mulf %242, %246 : vector<16x16xf32>
    %cst_73 = arith.constant dense<0.000000e+00> : vector<16x8xf32>
    %248 = tpu.matmul %247, %235, %cst_73 {dimension_numbers = #tpu.dot_dimension_numbers<[1], [0], [0], [1], [0, 0, 1, 1], [], []>} : vector<16x16xf32>, vector<16x8xf32>, vector<16x8xf32> -> vector<16x8xf32>
    %249 = tpu.concatenate %200, %216, %232, %248 in 1 : vector<16x8xf32>, vector<16x8xf32>, vector<16x8xf32>, vector<16x8xf32> -> vector<16x32xf32>
    %c1_74 = arith.constant 1 : index
    %c0_75 = arith.constant 0 : index
    %c0_76 = arith.constant 0 : index
    %250 = vector.load %arg4[%c1_74, %c0_75, %c0_76] : memref<2x32x32xf32, #tpu.memory_space<vmem>>, vector<1x32x32xf32>
    %251 = vector.shape_cast %250 : vector<1x32x32xf32> to vector<32x32xf32>
    %cst_77 = arith.constant dense<0.000000e+00> : vector<16x32xf32>
    %252 = tpu.matmul %249, %251, %cst_77 {dimension_numbers = #tpu.dot_dimension_numbers<[1], [0], [0], [1], [0, 0, 1, 1], [], []>} : vector<16x32xf32>, vector<32x32xf32>, vector<16x32xf32> -> vector<16x32xf32>
    %253 = vector.extract_strided_slice %0 {offsets = [12, 0], sizes = [1, 32], strides = [1, 1]} : vector<24x128xf32> to vector<1x32xf32>
    %254 = vector.broadcast %253 : vector<1x32xf32> to vector<16x32xf32>
    %255 = arith.addf %252, %254 : vector<16x32xf32>
    %256 = arith.addf %255, %178 : vector<16x32xf32>
    %257 = vector.extract_strided_slice %0 {offsets = [13, 0], sizes = [1, 32], strides = [1, 1]} : vector<24x128xf32> to vector<1x32xf32>
    %258 = vector.extract_strided_slice %0 {offsets = [14, 0], sizes = [1, 32], strides = [1, 1]} : vector<24x128xf32> to vector<1x32xf32>
    %cst_78 = arith.constant dense<0.000000e+00> : vector<16xf32>
    %259 = vector.multi_reduction <add>, %256, %cst_78 [1] : vector<16x32xf32> to vector<16xf32>
    %260 = vector.shape_cast %259 : vector<16xf32> to vector<16x1xf32>
    %cst_79 = arith.constant 3.200000e+01 : f32
    %261 = vector.broadcast %cst_79 : f32 to vector<16x1xf32>
    %262 = arith.divf %260, %261 : vector<16x1xf32>
    %263 = vector.broadcast %262 : vector<16x1xf32> to vector<16x32xf32>
    %264 = arith.subf %256, %263 : vector<16x32xf32>
    %265 = arith.mulf %264, %264 : vector<16x32xf32>
    %cst_80 = arith.constant dense<0.000000e+00> : vector<16xf32>
    %266 = vector.multi_reduction <add>, %265, %cst_80 [1] : vector<16x32xf32> to vector<16xf32>
    %267 = vector.shape_cast %266 : vector<16xf32> to vector<16x1xf32>
    %cst_81 = arith.constant 3.200000e+01 : f32
    %268 = vector.broadcast %cst_81 : f32 to vector<16x1xf32>
    %269 = arith.divf %267, %268 : vector<16x1xf32>
    %270 = vector.broadcast %262 : vector<16x1xf32> to vector<16x32xf32>
    %271 = arith.subf %256, %270 : vector<16x32xf32>
    %cst_82 = arith.constant 9.99999996E-13 : f32
    %272 = vector.broadcast %cst_82 : f32 to vector<16x1xf32>
    %273 = arith.addf %269, %272 : vector<16x1xf32>
    %274 = math.rsqrt %273 : vector<16x1xf32>
    %275 = vector.broadcast %274 : vector<16x1xf32> to vector<16x32xf32>
    %276 = arith.mulf %271, %275 : vector<16x32xf32>
    %277 = vector.broadcast %257 : vector<1x32xf32> to vector<16x32xf32>
    %278 = arith.mulf %276, %277 : vector<16x32xf32>
    %279 = vector.broadcast %258 : vector<1x32xf32> to vector<16x32xf32>
    %280 = arith.addf %278, %279 : vector<16x32xf32>
    %c1_83 = arith.constant 1 : index
    %c0_84 = arith.constant 0 : index
    %c0_85 = arith.constant 0 : index
    %281 = vector.load %arg5[%c1_83, %c0_84, %c0_85] : memref<2x32x128xf32, #tpu.memory_space<vmem>>, vector<1x32x128xf32>
    %282 = vector.shape_cast %281 : vector<1x32x128xf32> to vector<32x128xf32>
    %cst_86 = arith.constant dense<0.000000e+00> : vector<16x128xf32>
    %283 = tpu.matmul %280, %282, %cst_86 {dimension_numbers = #tpu.dot_dimension_numbers<[1], [0], [0], [1], [0, 0, 1, 1], [], []>} : vector<16x32xf32>, vector<32x128xf32>, vector<16x128xf32> -> vector<16x128xf32>
    %284 = vector.extract_strided_slice %0 {offsets = [15, 0], sizes = [1, 128], strides = [1, 1]} : vector<24x128xf32> to vector<1x128xf32>
    %285 = vector.broadcast %284 : vector<1x128xf32> to vector<16x128xf32>
    %286 = arith.addf %283, %285 : vector<16x128xf32>
    %cst_87 = arith.constant 5.000000e-01 : f32
    %287 = vector.broadcast %cst_87 : f32 to vector<16x128xf32>
    %288 = arith.mulf %287, %286 : vector<16x128xf32>
    %cst_88 = arith.constant 4.471500e-02 : f32
    %289 = vector.broadcast %cst_88 : f32 to vector<16x128xf32>
    %290 = arith.mulf %289, %286 : vector<16x128xf32>
    %291 = arith.mulf %290, %286 : vector<16x128xf32>
    %292 = arith.mulf %291, %286 : vector<16x128xf32>
    %293 = arith.addf %286, %292 : vector<16x128xf32>
    %cst_89 = arith.constant 0.797884583 : f32
    %294 = vector.broadcast %cst_89 : f32 to vector<16x128xf32>
    %295 = arith.mulf %294, %293 : vector<16x128xf32>
    %296 = math.tanh %295 : vector<16x128xf32>
    %cst_90 = arith.constant 1.000000e+00 : f32
    %297 = vector.broadcast %cst_90 : f32 to vector<16x128xf32>
    %298 = arith.addf %297, %296 : vector<16x128xf32>
    %299 = arith.mulf %288, %298 : vector<16x128xf32>
    %c1_91 = arith.constant 1 : index
    %c0_92 = arith.constant 0 : index
    %c0_93 = arith.constant 0 : index
    %300 = vector.load %arg6[%c1_91, %c0_92, %c0_93] : memref<2x128x32xf32, #tpu.memory_space<vmem>>, vector<1x128x32xf32>
    %301 = vector.shape_cast %300 : vector<1x128x32xf32> to vector<128x32xf32>
    %cst_94 = arith.constant dense<0.000000e+00> : vector<16x32xf32>
    %302 = tpu.matmul %299, %301, %cst_94 {dimension_numbers = #tpu.dot_dimension_numbers<[1], [0], [0], [1], [0, 0, 1, 1], [], []>} : vector<16x128xf32>, vector<128x32xf32>, vector<16x32xf32> -> vector<16x32xf32>
    %303 = vector.extract_strided_slice %0 {offsets = [16, 0], sizes = [1, 32], strides = [1, 1]} : vector<24x128xf32> to vector<1x32xf32>
    %304 = vector.broadcast %303 : vector<1x32xf32> to vector<16x32xf32>
    %305 = arith.addf %302, %304 : vector<16x32xf32>
    %306 = arith.addf %305, %280 : vector<16x32xf32>
    %307 = vector.extract_strided_slice %0 {offsets = [17, 0], sizes = [1, 32], strides = [1, 1]} : vector<24x128xf32> to vector<1x32xf32>
    %308 = vector.extract_strided_slice %0 {offsets = [18, 0], sizes = [1, 32], strides = [1, 1]} : vector<24x128xf32> to vector<1x32xf32>
    %cst_95 = arith.constant dense<0.000000e+00> : vector<16xf32>
    %309 = vector.multi_reduction <add>, %306, %cst_95 [1] : vector<16x32xf32> to vector<16xf32>
    %310 = vector.shape_cast %309 : vector<16xf32> to vector<16x1xf32>
    %cst_96 = arith.constant 3.200000e+01 : f32
    %311 = vector.broadcast %cst_96 : f32 to vector<16x1xf32>
    %312 = arith.divf %310, %311 : vector<16x1xf32>
    %313 = vector.broadcast %312 : vector<16x1xf32> to vector<16x32xf32>
    %314 = arith.subf %306, %313 : vector<16x32xf32>
    %315 = arith.mulf %314, %314 : vector<16x32xf32>
    %cst_97 = arith.constant dense<0.000000e+00> : vector<16xf32>
    %316 = vector.multi_reduction <add>, %315, %cst_97 [1] : vector<16x32xf32> to vector<16xf32>
    %317 = vector.shape_cast %316 : vector<16xf32> to vector<16x1xf32>
    %cst_98 = arith.constant 3.200000e+01 : f32
    %318 = vector.broadcast %cst_98 : f32 to vector<16x1xf32>
    %319 = arith.divf %317, %318 : vector<16x1xf32>
    %320 = vector.broadcast %312 : vector<16x1xf32> to vector<16x32xf32>
    %321 = arith.subf %306, %320 : vector<16x32xf32>
    %cst_99 = arith.constant 9.99999996E-13 : f32
    %322 = vector.broadcast %cst_99 : f32 to vector<16x1xf32>
    %323 = arith.addf %319, %322 : vector<16x1xf32>
    %324 = math.rsqrt %323 : vector<16x1xf32>
    %325 = vector.broadcast %324 : vector<16x1xf32> to vector<16x32xf32>
    %326 = arith.mulf %321, %325 : vector<16x32xf32>
    %327 = vector.broadcast %307 : vector<1x32xf32> to vector<16x32xf32>
    %328 = arith.mulf %326, %327 : vector<16x32xf32>
    %329 = vector.broadcast %308 : vector<1x32xf32> to vector<16x32xf32>
    %330 = arith.addf %328, %329 : vector<16x32xf32>
    %c0_100 = arith.constant 0 : index
    %c0_101 = arith.constant 0 : index
    %331 = vector.load %arg7[%c0_100, %c0_101] : memref<32x128xf32, #tpu.memory_space<vmem>>, vector<32x128xf32>
    %cst_102 = arith.constant dense<0.000000e+00> : vector<16x128xf32>
    %332 = tpu.matmul %330, %331, %cst_102 {dimension_numbers = #tpu.dot_dimension_numbers<[1], [0], [0], [1], [0, 0, 1, 1], [], []>} : vector<16x32xf32>, vector<32x128xf32>, vector<16x128xf32> -> vector<16x128xf32>
    %333 = vector.extract_strided_slice %0 {offsets = [2, 0], sizes = [1, 128], strides = [1, 1]} : vector<24x128xf32> to vector<1x128xf32>
    %334 = vector.broadcast %333 : vector<1x128xf32> to vector<16x128xf32>
    %335 = arith.addf %332, %334 : vector<16x128xf32>
    %c0_103 = arith.constant 0 : index
    %c0_104 = arith.constant 0 : index
    %336 = vector.load %arg8[%c0_103, %c0_104] : memref<16x128xf32, #tpu.memory_space<vmem>>, vector<16x128xf32>
    tpu.vector_store %arg8[%c0_103, %c0_104], %335 {strides = array<i32>} : memref<16x128xf32, #tpu.memory_space<vmem>>, vector<16x128xf32>,
    return
  }
}

</mosaic_0001>

<bundles_post_ra>
// kernel: life_advisor_forward.1
= control target key start
LH: loop header
LB: loop body
LE: loop exit
PB: predicated region body
PF: predicated region fallthrough
CT: control target
= control target key end

     0   :  { %vm36_vm0 = vcmask 261120   ;;  %v64_v23 = vlaneseq  ;;  %vm171_vm1 = vcmask 64512   ;;  %s3354_s18 = smov 96   ;;  %vm255_vm2 = vcmask 130048   ;;  %s3355_s23 = smov 64   ;;  %s4021_s0 = inlined_call_operand.vmem [shape: f32[16,32], index: 0, kind: input, shape index: {}]   ;;  %s4022_s3 = inlined_call_operand.vmem [shape: f32[2,32,128], index: 3, kind: input, shape index: {}]   ;;  %s4023_s2 = inlined_call_operand.vmem [shape: f32[24,128], index: 2, kind: input, shape index: {}]   ;;  %s4024_s1 = inlined_call_operand.vmem [shape: f32[16,16], index: 1, kind: input, shape index: {}]   ;;  %s4025_s4 = inlined_call_operand.vmem [shape: f32[2,32,32], index: 4, kind: input, shape index: {}]   ;;  %s4026_s5 = inlined_call_operand.vmem [shape: f32[2,32,128], index: 5, kind: input, shape index: {}]   ;;  %s4027_s6 = inlined_call_operand.vmem [shape: f32[2,128,32], index: 6, kind: input, shape index: {}]   ;;  %s4028_s7 = inlined_call_operand.vmem [shape: f32[32,128], index: 7, kind: input, shape index: {}]   ;;  %s4029_s8 = inlined_call_operand.vmem [shape: f32[16,128], index: 8, kind: output, shape index: {}]  }
   0x1   :  { %v34_v0 = vld [vmem:[%s4021_s0] sm:$0xff]  ;;  %v35_v1 = vld [vmem:[%s4021_s0 + $0x8] sm:$0xff]  ;;  %v79_v14 = vld [vmem:[%s4022_s3 + $0x18] sm:$0xff]  ;;  %s3356_s24 = smov 88   ;;  %s3357_s25 = smov 120   ;;  %vm993_vm3 = vcmask 195584  }
   0x2   :  { %v37_v2 = vsel %vm36_vm0, %v34_v0, 0.0  ;;  %v40_v3 = vsel %vm36_vm0, %v35_v1, 0.0  ;;  %v78_v15 = vld [vmem:[%s4022_s3 + $0x10] sm:$0xff]  ;;  %2986 = vmatprep.subr.mxu1 %v79_v14  ;;  %v77_v16 = vld [vmem:[%s4022_s3 + $0x8] sm:$0xff]  ;;  %v76_v17 = vld [vmem:[%s4022_s3] sm:$0xff]  ;;  %v3435_v25 = vshrl.u32 %v64_v23, 7 }
   0x3   :  { %38 = vadd.xlane.f32.xlu0 %v37_v2  ;;  %2987 = vmatpush3.msra.mxu1 %v79_v14  ;;  %v3443_v27 = vld [vmem:[%s4023_s2] sm:$0xff]  ;;  %v3483_v47 = vld [vmem:[%s4024_s1 + $0x8] sm:$0xff]  ;;  %s3358_s26 = smov 56   ;;  %s3359_s27 = smov 80  }
   0x4   :  { %2988 = vmatprep.subr.mxu1 %v78_v15  ;;  %v3438_v26 = vsub.s32 0, %v3435_v25  ;;  %v3446_v28 = vsub.s32 1, %v3435_v25  ;;  %v82_v39 = vsub.s32 3, %v3435_v25  ;;  %v3488_v49 = vld [vmem:[%s4024_s1] sm:$0xff]  ;;  %s3360_s28 = smov 112   ;;  %s3361_s29 = smov 48  }
   0x5   :  { %2989 = vmatpush3.msra.mxu1 %v78_v15  ;;  %s3362_s30 = smov 72   ;;  %s3363_s0 = smov 104  }
   0x6   :  { %2990 = vmatprep.subr.mxu1 %v77_v16  ;;  %v67_v29 = vrot.slane %v3443_v27, %v3438_v26  ;;  %v73_v32 = vrot.slane %v3443_v27, %v3446_v28  ;;  %v83_v40 = vrot.slane %v3443_v27, %v82_v39  ;;  %s3364_s9 = smov 40   ;;  %s3365_s10 = smov 8  }
   0x7   :  { %41 = vadd.xlane.f32.xlu0 %v40_v3  ;;  %2991 = vmatpush3.msra.mxu1 %v77_v16  ;;  %s3366_s11 = smov 16   ;;  %s3367_s21 = smov 24  }
   0x8   :  { %2992 = vmatprep.subr.mxu1 %v76_v17 }
   0x9   :  { %2993 = vmatpush3.msra.mxu1 %v76_v17 }
  0x8c   :  { %v39_v4 = vpop.xlane.xlu0 %38 }
  0x8d   :  { %v44_v5 = vmul.f32 0.03125, %v39_v4 }
  0x8f   :  { %v46_v6 = vsub.f32 %v34_v0, %v44_v5 }
  0x90   :  { %v42_v7 = vpop.xlane.xlu0 %41 }
  0x91   :  { %v45_v8 = vmul.f32 0.03125, %v42_v7  ;;  %v48_v9 = vmul.f32 %v46_v6, %v46_v6 }
  0x93   :  { %v47_v10 = vsub.f32 %v35_v1, %v45_v8  ;;  %v50_v11 = vsel %vm36_vm0, %v48_v9, 0.0 }
  0x94   :  { %51 = vadd.xlane.f32.xlu1 %v50_v11 }
  0x95   :  { %v49_v12 = vmul.f32 %v47_v10, %v47_v10 }
  0x97   :  { %v53_v13 = vsel %vm36_vm0, %v49_v12, 0.0 }
  0x98   :  { %54 = vadd.xlane.f32.xlu1 %v53_v13 }
 0x11d   :  { %v52_v18 = vpop.xlane.xlu1 %51 }
 0x11e   :  { %v56_v19 = vmul.f32 0.03125, %v52_v18 }
 0x120   :  { %v58_v20 = vadd.f32 1e-12, %v56_v19 }
 0x121   :  { %v55_v21 = vpop.xlane.xlu1 %54 }
 0x122   :  { %3259 = vrsqrt.f32 %v58_v20  ;;  %v57_v22 = vmul.f32 0.03125, %v55_v21 }
 0x124   :  { %v59_v24 = vadd.f32 1e-12, %v57_v22 }
 0x126   :  { %3261 = vrsqrt.f32 %v59_v24 }
 0x12f   :  { %v3260_v30 = vpop.eup %3259 }
 0x130   :  { %v62_v31 = vmul.f32 %v3260_v30, %v46_v6 }
 0x132   :  { %v68_v33 = vmul.f32 %v67_v29, %v62_v31 }
 0x133   :  { %v3262_v34 = vpop.eup %3261 }
 0x134   :  { %v63_v35 = vmul.f32 %v3262_v34, %v47_v10  ;;  %v3452_v36 = vadd.f32 %v73_v32, %v68_v33 }
 0x136   :  { %v69_v37 = vmul.f32 %v67_v29, %v63_v35  ;;  %2994 = vmatprep.mubr.msk.f32.mxu1 %vm36_vm0, %v3452_v36 }
 0x138   :  { %v3456_v38 = vadd.f32 %v73_v32, %v69_v37 }
 0x13a   :  { %2995 = vmatmul.mubr.msk.f32.vlgmr.msra.gmra.mxu1 %vm36_vm0, %v3456_v38 }
 0x1fa   :  { %v2996_v41 = vpop.f32.mrf.mxu1 }
 0x1fb   :  { %v3464_v42 = vadd.f32 %v2996_v41, %v83_v40 }
 0x1fc   :  { %v156_v43 = vpop.f32.mrf.mxu1 }
 0x1fd   :  { %v3466_v44 = vadd.f32 %v156_v43, %v83_v40  ;;  %169 = vrot.lane.b32.xlu0 %v3464_v42, %s3354_s18 }
 0x1ff   :  { %167 = vrot.lane.b32.xlu1 %v3466_v44, %s3354_s18  ;;  %3001 = vmatprep.mubr.msk.f32.mxu1 %vm171_vm1, %v3466_v44 }
 0x26f   :  { %v170_v45 = vpop.permute.xlu0 %169 }
 0x270   :  { %2997 = vmatprep.subr.msk.mxu1 %vm171_vm1, %v170_v45 }
 0x271   :  { %2998 = vmatpush3.xpose.msk.msra.mxu1 %vm171_vm1, %v170_v45  ;;  %v168_v46 = vpop.permute.xlu1 %167 }
 0x272   :  { %2999 = vmatprep.subr.msk.mxu1 %vm171_vm1, %v168_v46 }
 0x275   :  { %3000 = vmatpush3.xpose.msk.msra.mxu1 %vm171_vm1, %v168_v46 }
 0x278   :  { %3002 = vmatmul.mubr.msk.f32.vlgmr.msra.gmra.mxu1 %vm171_vm1, %v3464_v42 }
 0x338   :  { %v3003_v48 = vpop.f32.mrf.mxu1 }
 0x339   :  { %v252_v50 = vadd.f32 %v3003_v48, %v3483_v47 }
 0x33a   :  { %v246_v51 = vpop.f32.mrf.mxu1 }
 0x33b   :  { %v247_v52 = vadd.f32 %v246_v51, %v3488_v49  ;;  %v259_v53 = vsel %vm255_vm2, %v252_v50, -inf }
 0x33c   :  { %260 = vmax.xlane.f32.xlu0 %v259_v53 }
 0x33d   :  { %v256_v54 = vsel %vm255_vm2, %v247_v52, -inf }
 0x33e   :  { %257 = vmax.xlane.f32.xlu1 %v256_v54 }
 0x3c5   :  { %v261_v55 = vpop.xlane.xlu0 %260 }
 0x3c6   :  { %v263_v56 = vsub.f32 %v252_v50, %v261_v55 }
 0x3c7   :  { %v258_v57 = vpop.xlane.xlu1 %257 }
 0x3c8   :  { %v266_v58 = vmul.f32 1.442695, %v263_v56  ;;  %v262_v59 = vsub.f32 %v247_v52, %v258_v57 }
 0x3ca   :  { %3263 = vpow2.f32 %v266_v58  ;;  %v264_v60 = vmul.f32 1.442695, %v262_v59 }
 0x3cc   :  { %3265 = vpow2.f32 %v264_v60 }
 0x3d7   :  { %v3264_v61 = vpop.eup %3263 }
 0x3d8   :  { %v271_v62 = vsel %vm255_vm2, %v3264_v61, 0.0 }
 0x3d9   :  { %v3266_v63 = vpop.eup %3265  ;;  %272 = vadd.xlane.f32.xlu1 %v271_v62 }
 0x3da   :  { %v268_v0 = vsel %vm255_vm2, %v3266_v63, 0.0 }
 0x3db   :  { %269 = vadd.xlane.f32.xlu0 %v268_v0 }
 0x3ea   :  { %278 = vrot.lane.b32.xlu1 %v3466_v44, %s3355_s23 }
 0x3ee   :  { %371 = vrot.lane.b32.xlu1 %v3464_v42, %s3356_s24 }
 0x3f1   :  { %280 = vrot.lane.b32.xlu0 %v3464_v42, %s3355_s23 }
 0x3f2   :  { %369 = vrot.lane.b32.xlu1 %v3466_v44, %s3356_s24 }
 0x3f5   :  { %365 = vrot.lane.b32.xlu0 %v3466_v44, %s3357_s25 }
 0x3f6   :  { %367 = vrot.lane.b32.xlu1 %v3464_v42, %s3357_s25 }
 0x462   :  { %v273_v1 = vpop.xlane.xlu1 %272 }
 0x463   :  { %3267 = vrcp.f32 %v273_v1 }
 0x464   :  { %v270_v2 = vpop.xlane.xlu0 %269 }
 0x465   :  { %3269 = vrcp.f32 %v270_v2 }
 0x466   :  { %v279_v3 = vpop.permute.xlu1 %278 }
 0x468   :  { %v281_v4 = vpop.permute.xlu0 %280 }
 0x469   :  { %3004 = vmatprep.subr.mxu1 %v281_v4 }
 0x46a   :  { %3005 = vmatpush3.msra.mxu1 %v281_v4  ;;  %v372_v5 = vpop.permute.xlu1 %371 }
 0x46b   :  { %3006 = vmatprep.subr.mxu1 %v279_v3 }
 0x46c   :  { %3007 = vmatpush3.msra.mxu1 %v279_v3  ;;  %v366_v10 = vpop.permute.xlu0 %365 }
 0x46d   :  { %3011 = vmatprep.subr.msk.mxu1 %vm171_vm1, %v372_v5 }
 0x46e   :  { %v370_v11 = vpop.permute.xlu1 %369 }
 0x470   :  { %v3268_v6 = vpop.eup %3267 }
 0x471   :  { %v277_v9 = vmul.f32 %v3268_v6, %v3264_v61 }
 0x472   :  { %v3270_v7 = vpop.eup %3269  ;;  %v368_v12 = vpop.permute.xlu1 %367 }
 0x473   :  { %v276_v8 = vmul.f32 %v3270_v7, %v3266_v63 }
 0x475   :  { %3008 = vmatprep.mubr.msk.f32.mxu1 %vm255_vm2, %v276_v8 }
 0x476   :  { %3009 = vmatmul.mubr.msk.f32.vlgmr.msra.gmra.mxu1 %vm255_vm2, %v277_v9 }
 0x477   :  { %3012 = vmatpush3.xpose.msk.msra.mxu1 %vm171_vm1, %v372_v5  ;;  %3015 = vmatprep.mubr.msk.f32.mxu1 %vm171_vm1, %v366_v10 }
 0x478   :  { %3013 = vmatprep.subr.msk.mxu1 %vm171_vm1, %v370_v11 }
 0x47b   :  { %3014 = vmatpush3.xpose.msk.msra.mxu1 %vm171_vm1, %v370_v11 }
 0x47e   :  { %3016 = vmatmul.mubr.msk.f32.vlgmr.msra.gmra.mxu1 %vm171_vm1, %v368_v12 }
 0x536   :  { %v3516_v13 = vpop.f32.mrf.mxu1 }
 0x538   :  { %v3518_v14 = vpop.f32.mrf.mxu1 }
 0x53e   :  { %v3017_v15 = vpop.f32.mrf.mxu1 }
 0x53f   :  { %v453_v16 = vadd.f32 %v3017_v15, %v3483_v47 }
 0x540   :  { %v447_v17 = vpop.f32.mrf.mxu1 }
 0x541   :  { %v448_v18 = vadd.f32 %v447_v17, %v3488_v49  ;;  %v459_v19 = vsel %vm255_vm2, %v453_v16, -inf }
 0x542   :  { %460 = vmax.xlane.f32.xlu1 %v459_v19 }
 0x543   :  { %v456_v20 = vsel %vm255_vm2, %v448_v18, -inf }
 0x544   :  { %457 = vmax.xlane.f32.xlu0 %v456_v20 }
 0x553   :  { %478 = vrot.lane.b32.xlu1 %v3466_v44, %s3358_s26 }
 0x557   :  { %571 = vrot.lane.b32.xlu1 %v3464_v42, %s3359_s27 }
 0x55b   :  { %569 = vrot.lane.b32.xlu1 %v3466_v44, %s3359_s27 }
 0x55f   :  { %567 = vrot.lane.b32.xlu1 %v3464_v42, %s3360_s28 }
 0x5cb   :  { %v461_v21 = vpop.xlane.xlu1 %460 }
 0x5cc   :  { %v463_v22 = vsub.f32 %v453_v16, %v461_v21 }
 0x5cd   :  { %v458_v23 = vpop.xlane.xlu0 %457 }
 0x5ce   :  { %v466_v24 = vmul.f32 1.442695, %v463_v22  ;;  %v462_v29 = vsub.f32 %v448_v18, %v458_v23 }
 0x5cf   :  { %v479_v40 = vpop.permute.xlu1 %478 }
 0x5d0   :  { %3271 = vpow2.f32 %v466_v24  ;;  %v464_v30 = vmul.f32 1.442695, %v462_v29 }
 0x5d2   :  { %3273 = vpow2.f32 %v464_v30 }
 0x5d3   :  { %v572_v43 = vpop.permute.xlu1 %571 }
 0x5d7   :  { %v570_v52 = vpop.permute.xlu1 %569 }
 0x5db   :  { %v568_v53 = vpop.permute.xlu1 %567 }
 0x5dd   :  { %v3272_v31 = vpop.eup %3271 }
 0x5de   :  { %v471_v32 = vsel %vm255_vm2, %v3272_v31, 0.0 }
 0x5df   :  { %v3274_v33 = vpop.eup %3273  ;;  %472 = vadd.xlane.f32.xlu0 %v471_v32 }
 0x5e0   :  { %v468_v34 = vsel %vm255_vm2, %v3274_v33, 0.0 }
 0x5e3   :  { %469 = vadd.xlane.f32.xlu0 %v468_v34 }
 0x5f9   :  { %480 = vrot.lane.b32.xlu0 %v3464_v42, %s3358_s26 }
 0x5fd   :  { %565 = vrot.lane.b32.xlu0 %v3466_v44, %s3360_s28 }
 0x668   :  { %v473_v35 = vpop.xlane.xlu0 %472 }
 0x669   :  { %3275 = vrcp.f32 %v473_v35 }
 0x66c   :  { %v470_v37 = vpop.xlane.xlu0 %469 }
 0x66d   :  { %3277 = vrcp.f32 %v470_v37 }
 0x670   :  { %v481_v41 = vpop.permute.xlu0 %480 }
 0x671   :  { %3018 = vmatprep.subr.mxu0 %v481_v41 }
 0x672   :  { %3019 = vmatpush3.msra.mxu0 %v481_v41 }
 0x673   :  { %3020 = vmatprep.subr.mxu0 %v479_v40 }
 0x674   :  { %3021 = vmatpush3.msra.mxu0 %v479_v40  ;;  %v566_v51 = vpop.permute.xlu0 %565 }
 0x675   :  { %3025 = vmatprep.subr.msk.mxu0 %vm171_vm1, %v572_v43 }
 0x676   :  { %v3276_v45 = vpop.eup %3275 }
 0x677   :  { %v477_v50 = vmul.f32 %v3276_v45, %v3272_v31 }
 0x67a   :  { %v3278_v46 = vpop.eup %3277 }
 0x67b   :  { %v476_v48 = vmul.f32 %v3278_v46, %v3274_v33 }
 0x67d   :  { %3022 = vmatprep.mubr.msk.f32.mxu0 %vm255_vm2, %v476_v48 }
 0x67e   :  { %3023 = vmatmul.mubr.msk.f32.vlgmr.msra.gmra.mxu0 %vm255_vm2, %v477_v50 }
 0x67f   :  { %3026 = vmatpush3.xpose.msk.msra.mxu0 %vm171_vm1, %v572_v43  ;;  %3029 = vmatprep.mubr.msk.f32.mxu0 %vm171_vm1, %v566_v51 }
 0x680   :  { %3027 = vmatprep.subr.msk.mxu0 %vm171_vm1, %v570_v52 }
 0x683   :  { %3028 = vmatpush3.xpose.msk.msra.mxu0 %vm171_vm1, %v570_v52 }
 0x686   :  { %3030 = vmatmul.mubr.msk.f32.vlgmr.msra.gmra.mxu0 %vm171_vm1, %v568_v53 }
 0x73e   :  { %v3546_v54 = vpop.f32.mrf.mxu0 }
 0x740   :  { %v3548_v55 = vpop.f32.mrf.mxu0 }
 0x746   :  { %v3031_v56 = vpop.f32.mrf.mxu0 }
 0x747   :  { %v653_v57 = vadd.f32 %v3031_v56, %v3483_v47 }
 0x748   :  { %v647_v58 = vpop.f32.mrf.mxu0 }
 0x749   :  { %v648_v59 = vadd.f32 %v647_v58, %v3488_v49  ;;  %v659_v60 = vsel %vm255_vm2, %v653_v57, -inf  ;;  %v998_v58 = vld [vmem:[%s4025_s4 + $0x10] sm:$0xff] }
 0x74a   :  { %660 = vmax.xlane.f32.xlu1 %v659_v60  ;;  %v996_v60 = vld [vmem:[%s4025_s4] sm:$0xff] }
 0x74b   :  { %v656_v61 = vsel %vm255_vm2, %v648_v59, -inf }
 0x74c   :  { %657 = vmax.xlane.f32.xlu0 %v656_v61 }
 0x75b   :  { %678 = vrot.lane.b32.xlu1 %v3466_v44, %s3361_s29 }
 0x75f   :  { %771 = vrot.lane.b32.xlu1 %v3464_v42, %s3362_s30 }
 0x763   :  { %769 = vrot.lane.b32.xlu1 %v3466_v44, %s3362_s30 }
 0x767   :  { %767 = vrot.lane.b32.xlu1 %v3464_v42, %s3363_s0 }
 0x7d3   :  { %v661_v62 = vpop.xlane.xlu1 %660 }
 0x7d4   :  { %v663_v63 = vsub.f32 %v653_v57, %v661_v62 }
 0x7d5   :  { %v658_v0 = vpop.xlane.xlu0 %657 }
 0x7d6   :  { %v666_v1 = vmul.f32 1.442695, %v663_v63  ;;  %v662_v2 = vsub.f32 %v648_v59, %v658_v0  ;;  %v997_v59 = vld [vmem:[%s4025_s4 + $0x8] sm:$0xff] }
 0x7d7   :  { %v679_v10 = vpop.permute.xlu1 %678 }
 0x7d8   :  { %3279 = vpow2.f32 %v666_v1  ;;  %v664_v3 = vmul.f32 1.442695, %v662_v2 }
 0x7da   :  { %3281 = vpow2.f32 %v664_v3 }
 0x7db   :  { %v772_v12 = vpop.permute.xlu1 %771 }
 0x7df   :  { %v770_v20 = vpop.permute.xlu1 %769 }
 0x7e3   :  { %v768_v21 = vpop.permute.xlu1 %767 }
 0x7e5   :  { %v3280_v4 = vpop.eup %3279 }
 0x7e6   :  { %v671_v5 = vsel %vm255_vm2, %v3280_v4, 0.0 }
 0x7e7   :  { %v3282_v6 = vpop.eup %3281  ;;  %672 = vadd.xlane.f32.xlu0 %v671_v5 }
 0x7e8   :  { %v668_v7 = vsel %vm255_vm2, %v3282_v6, 0.0 }
 0x7eb   :  { %669 = vadd.xlane.f32.xlu0 %v668_v7 }
 0x801   :  { %680 = vrot.lane.b32.xlu0 %v3464_v42, %s3361_s29 }
 0x805   :  { %765 = vrot.lane.b32.xlu0 %v3466_v44, %s3363_s0 }
 0x870   :  { %v673_v8 = vpop.xlane.xlu0 %672 }
 0x871   :  { %3283 = vrcp.f32 %v673_v8 }
 0x874   :  { %v670_v9 = vpop.xlane.xlu0 %669 }
 0x875   :  { %3285 = vrcp.f32 %v670_v9 }
 0x878   :  { %v681_v11 = vpop.permute.xlu0 %680 }
 0x879   :  { %3032 = vmatprep.subr.mxu1 %v681_v11 }
 0x87a   :  { %3033 = vmatpush3.msra.mxu1 %v681_v11 }
 0x87b   :  { %3034 = vmatprep.subr.mxu1 %v679_v10 }
 0x87c   :  { %3035 = vmatpush3.msra.mxu1 %v679_v10  ;;  %v766_v19 = vpop.permute.xlu0 %765 }
 0x87d   :  { %3039 = vmatprep.subr.msk.mxu1 %vm171_vm1, %v772_v12 }
 0x87e   :  { %v3284_v15 = vpop.eup %3283 }
 0x87f   :  { %v677_v18 = vmul.f32 %v3284_v15, %v3280_v4 }
 0x882   :  { %v3286_v16 = vpop.eup %3285 }
 0x883   :  { %v676_v17 = vmul.f32 %v3286_v16, %v3282_v6 }
 0x885   :  { %3036 = vmatprep.mubr.msk.f32.mxu1 %vm255_vm2, %v676_v17 }
 0x886   :  { %3037 = vmatmul.mubr.msk.f32.vlgmr.msra.gmra.mxu1 %vm255_vm2, %v677_v18 }
 0x887   :  { %3040 = vmatpush3.xpose.msk.msra.mxu1 %vm171_vm1, %v772_v12  ;;  %3043 = vmatprep.mubr.msk.f32.mxu1 %vm171_vm1, %v766_v19 }
 0x888   :  { %3041 = vmatprep.subr.msk.mxu1 %vm171_vm1, %v770_v20 }
 0x88b   :  { %3042 = vmatpush3.xpose.msk.msra.mxu1 %vm171_vm1, %v770_v20 }
 0x88e   :  { %3044 = vmatmul.mubr.msk.f32.vlgmr.msra.gmra.mxu1 %vm171_vm1, %v768_v21 }
 0x946   :  { %v3038_v22 = vpop.f32.mrf.mxu1 }
 0x948   :  { %v756_v23 = vpop.f32.mrf.mxu1 }
 0x94e   :  { %v3045_v24 = vpop.f32.mrf.mxu1 }
 0x94f   :  { %v853_v29 = vadd.f32 %v3045_v24, %v3483_v47 }
 0x950   :  { %v847_v30 = vpop.f32.mrf.mxu1 }
 0x951   :  { %v848_v31 = vadd.f32 %v847_v30, %v3488_v49  ;;  %v859_v32 = vsel %vm255_vm2, %v853_v29, -inf }
 0x952   :  { %860 = vmax.xlane.f32.xlu1 %v859_v32 }
 0x953   :  { %v856_v33 = vsel %vm255_vm2, %v848_v31, -inf }
 0x954   :  { %857 = vmax.xlane.f32.xlu0 %v856_v33 }
 0x963   :  { %878 = vrot.lane.b32.xlu1 %v3466_v44, %s3364_s9 }
 0x967   :  { %967 = vrot.lane.b32.xlu1 %v3548_v55, %s3365_s10 }
 0x96b   :  { %969 = vrot.lane.b32.xlu1 %v3546_v54, %s3365_s10 }
 0x96f   :  { %977 = vrot.lane.b32.xlu1 %v3038_v22, %s3366_s11 }
 0x9db   :  { %v861_v34 = vpop.xlane.xlu1 %860 }
 0x9dc   :  { %v863_v35 = vsub.f32 %v853_v29, %v861_v34  ;;  %v1127_v34 = vld [vmem:[%s4026_s5 + $0x10] sm:$0xff] }
 0x9dd   :  { %v858_v37 = vpop.xlane.xlu0 %857 }
 0x9de   :  { %v866_v40 = vmul.f32 1.442695, %v863_v35  ;;  %v862_v41 = vsub.f32 %v848_v31, %v858_v37  ;;  %v1126_v35 = vld [vmem:[%s4026_s5 + $0x8] sm:$0xff]  ;;  %v1125_v37 = vld [vmem:[%s4026_s5] sm:$0xff] }
 0x9df   :  { %v879_v53 = vpop.permute.xlu1 %878 }
 0x9e0   :  { %3287 = vpow2.f32 %v866_v40  ;;  %v864_v43 = vmul.f32 1.442695, %v862_v41 }
 0x9e2   :  { %3289 = vpow2.f32 %v864_v43 }
 0x9e3   :  { %v968_v63 = vpop.permute.xlu1 %967 }
 0x9e4   :  { %v989_v3 = vsel %vm171_vm1, %v3518_v14, %v968_v63  ;;  %v1002_v14 = vsub.s32 4, %v3435_v25  ;;  %v1244_v63 = vld [vmem:[%s4027_s6 + $0x60] sm:$0xff] }
 0x9e6   :  { %v1003_v11 = vrot.slane %v3443_v27, %v1002_v14 }
 0x9e7   :  { %v970_v0 = vpop.permute.xlu1 %969 }
 0x9e8   :  { %v990_v5 = vsel %vm171_vm1, %v3516_v13, %v970_v0  ;;  %v1243_v0 = vld [vmem:[%s4027_s6 + $0x58] sm:$0xff] }
 0x9eb   :  { %v978_v1 = vpop.permute.xlu1 %977 }
 0x9ec   :  { %v992_v8 = vsel %vm255_vm2, %v990_v5, %v978_v1  ;;  %v1242_v1 = vld [vmem:[%s4027_s6 + $0x50] sm:$0xff] }
 0x9ed   :  { %v3288_v45 = vpop.eup %3287  ;;  %v1238_v5 = vld [vmem:[%s4027_s6 + $0x30] sm:$0xff] }
 0x9ee   :  { %v871_v44 = vsel %vm255_vm2, %v3288_v45, 0.0 }
 0x9ef   :  { %v3290_v46 = vpop.eup %3289  ;;  %872 = vadd.xlane.f32.xlu0 %v871_v44 }
 0x9f0   :  { %v868_v48 = vsel %vm255_vm2, %v3290_v46, 0.0 }
 0x9f3   :  { %869 = vadd.xlane.f32.xlu0 %v868_v48  ;;  %v1115_v48 = vsub.s32 5, %v3435_v25 }
 0xa09   :  { %880 = vrot.lane.b32.xlu0 %v3464_v42, %s3364_s9  ;;  %v999_v42 = vld [vmem:[%s4025_s4 + $0x18] sm:$0xff] }
 0xa0d   :  { %975 = vrot.lane.b32.xlu0 %v756_v23, %s3366_s11 }
 0xa78   :  { %v873_v50 = vpop.xlane.xlu0 %872 }
 0xa79   :  { %3291 = vrcp.f32 %v873_v50  ;;  %v1121_v50 = vsub.s32 6, %v3435_v25 }
 0xa7c   :  { %v870_v51 = vpop.xlane.xlu0 %869 }
 0xa7d   :  { %3293 = vrcp.f32 %v870_v51  ;;  %v1116_v51 = vrot.slane %v3443_v27, %v1115_v48 }
 0xa80   :  { %v881_v52 = vpop.permute.xlu0 %880 }
 0xa81   :  { %3046 = vmatprep.subr.mxu0 %v881_v52 }
 0xa82   :  { %3047 = vmatpush3.msra.mxu0 %v881_v52 }
 0xa83   :  { %3048 = vmatprep.subr.mxu0 %v879_v53 }
 0xa84   :  { %3049 = vmatpush3.msra.mxu0 %v879_v53  ;;  %v976_v2 = vpop.permute.xlu0 %975 }
 0xa85   :  { %3053 = vmatprep.subr.mxu0 %v999_v42  ;;  %v991_v6 = vsel %vm255_vm2, %v989_v3, %v976_v2  ;;  %v1241_v2 = vld [vmem:[%s4027_s6 + $0x48] sm:$0xff]  ;;  %v1240_v3 = vld [vmem:[%s4027_s6 + $0x40] sm:$0xff] }
 0xa86   :  { %v3292_v54 = vpop.eup %3291 }
 0xa87   :  { %v877_v57 = vmul.f32 %v3292_v54, %v3288_v45  ;;  %v1122_v54 = vrot.slane %v3443_v27, %v1121_v50 }
 0xa8a   :  { %v3294_v55 = vpop.eup %3293 }
 0xa8b   :  { %v876_v56 = vmul.f32 %v3294_v55, %v3290_v46 }
 0xa8d   :  { %3050 = vmatprep.mubr.msk.f32.mxu0 %vm255_vm2, %v876_v56 }
 0xa8e   :  { %3051 = vmatmul.mubr.msk.f32.vlgmr.msra.gmra.mxu0 %vm255_vm2, %v877_v57 }
 0xa8f   :  { %3054 = vmatpush3.msra.mxu0 %v999_v42 }
 0xa90   :  { %3055 = vmatprep.subr.mxu0 %v998_v58 }
 0xa91   :  { %3056 = vmatpush3.msra.mxu0 %v998_v58 }
 0xa92   :  { %3057 = vmatprep.subr.mxu0 %v997_v59 }
 0xa93   :  { %3058 = vmatpush3.msra.mxu0 %v997_v59 }
 0xa94   :  { %3059 = vmatprep.subr.mxu0 %v996_v60 }
 0xa95   :  { %3060 = vmatpush3.msra.mxu0 %v996_v60  ;;  %v1247_v60 = vld [vmem:[%s4027_s6 + $0x78] sm:$0xff] }
 0xa96   :  { %3075 = vmatprep.subr.mxu0 %v1247_v60 }
 0xb4e   :  { %v3052_v61 = vpop.f32.mrf.mxu0 }
 0xb4f   :  { %985 = vrot.lane.b32.xlu1 %v3052_v61, %s3367_s21  ;;  %v1246_v61 = vld [vmem:[%s4027_s6 + $0x70] sm:$0xff] }
 0xb50   :  { %v956_v62 = vpop.f32.mrf.mxu0 }
 0xb51   :  { %983 = vrot.lane.b32.xlu0 %v956_v62, %s3367_s21  ;;  %v1245_v62 = vld [vmem:[%s4027_s6 + $0x68] sm:$0xff] }
 0xbc1   :  { %v986_v4 = vpop.permute.xlu1 %985 }
 0xbc2   :  { %v995_v10 = vsel %vm993_vm3, %v992_v8, %v986_v4  ;;  %v1239_v4 = vld [vmem:[%s4027_s6 + $0x38] sm:$0xff] }
 0xbc3   :  { %v984_v7 = vpop.permute.xlu0 %983  ;;  %v1235_v8 = vld [vmem:[%s4027_s6 + $0x18] sm:$0xff] }
 0xbc4   :  { %v994_v9 = vsel %vm993_vm3, %v991_v6, %v984_v7  ;;  %v1237_v6 = vld [vmem:[%s4027_s6 + $0x28] sm:$0xff]  ;;  %v1236_v7 = vld [vmem:[%s4027_s6 + $0x20] sm:$0xff] }
 0xbc5   :  { %3061 = vmatprep.mubr.msk.f32.mxu0 %vm36_vm0, %v994_v9  ;;  %v1234_v9 = vld [vmem:[%s4027_s6 + $0x10] sm:$0xff] }
 0xbc6   :  { %3062 = vmatmul.mubr.msk.f32.vlgmr.msra.gmra.mxu0 %vm36_vm0, %v995_v10  ;;  %v1233_v10 = vld [vmem:[%s4027_s6 + $0x8] sm:$0xff] }
 0xbc7   :  { %3076 = vmatpush3.msra.mxu0 %v1247_v60 }
 0xbc8   :  { %3077 = vmatprep.subr.mxu0 %v1246_v61 }
 0xbc9   :  { %3078 = vmatpush3.msra.mxu0 %v1246_v61 }
 0xbca   :  { %3079 = vmatprep.subr.mxu0 %v1245_v62 }
 0xbcb   :  { %3080 = vmatpush3.msra.mxu0 %v1245_v62 }
 0xbcc   :  { %3081 = vmatprep.subr.mxu0 %v1244_v63 }
 0xbcd   :  { %3082 = vmatpush3.msra.mxu0 %v1244_v63 }
 0xbce   :  { %3083 = vmatprep.subr.mxu0 %v1243_v0 }
 0xbcf   :  { %3084 = vmatpush3.msra.mxu0 %v1243_v0 }
 0xbd0   :  { %3085 = vmatprep.subr.mxu0 %v1242_v1 }
 0xbd1   :  { %3086 = vmatpush3.msra.mxu0 %v1242_v1 }
 0xbd2   :  { %3087 = vmatprep.subr.mxu0 %v1241_v2 }
 0xbd3   :  { %3088 = vmatpush3.msra.mxu0 %v1241_v2  ;;  %v2786_v2 = vld [vmem:[%s4022_s3 + $0x30] sm:$0xff] }
 0xbd4   :  { %3089 = vmatprep.subr.mxu0 %v1240_v3 }
 0xbd5   :  { %3090 = vmatpush3.msra.mxu0 %v1240_v3  ;;  %v2785_v3 = vld [vmem:[%s4022_s3 + $0x28] sm:$0xff] }
 0xbd6   :  { %3091 = vmatprep.subr.mxu0 %v1239_v4 }
 0xbd7   :  { %3092 = vmatpush3.msra.mxu0 %v1239_v4  ;;  %v2784_v4 = vld [vmem:[%s4022_s3 + $0x20] sm:$0xff] }
 0xbd8   :  { %3093 = vmatprep.subr.mxu0 %v1238_v5 }
 0xbd9   :  { %3094 = vmatpush3.msra.mxu0 %v1238_v5 }
 0xbda   :  { %3095 = vmatprep.subr.mxu0 %v1237_v6 }
 0xbdb   :  { %3096 = vmatpush3.msra.mxu0 %v1237_v6 }
 0xbdc   :  { %3097 = vmatprep.subr.mxu0 %v1236_v7 }
 0xbdd   :  { %3098 = vmatpush3.msra.mxu0 %v1236_v7 }
 0xbde   :  { %3099 = vmatprep.subr.mxu0 %v1235_v8 }
 0xbdf   :  { %3100 = vmatpush3.msra.mxu0 %v1235_v8 }
 0xbe0   :  { %3101 = vmatprep.subr.mxu0 %v1234_v9 }
 0xbe1   :  { %3102 = vmatpush3.msra.mxu0 %v1234_v9 }
 0xbe2   :  { %3103 = vmatprep.subr.mxu0 %v1233_v10 }
 0xbe3   :  { %3104 = vmatpush3.msra.mxu0 %v1233_v10 }
 0xc86   :  { %v3063_v13 = vpop.f32.mrf.mxu0 }
 0xc87   :  { %v1082_v12 = vadd.f32 %v3063_v13, %v1003_v11  ;;  %v1131_v13 = vsub.s32 7, %v3435_v25 }
 0xc88   :  { %v1076_v15 = vpop.f32.mrf.mxu0 }
 0xc89   :  { %v1077_v16 = vadd.f32 %v1076_v15, %v1003_v11  ;;  %v1086_v17 = vadd.f32 %v1082_v12, %v3456_v38  ;;  %v1232_v11 = vld [vmem:[%s4027_s6] sm:$0xff]  ;;  %v1132_v12 = vrot.slane %v3443_v27, %v1131_v13 }
 0xc8a   :  { %3105 = vmatprep.subr.mxu0 %v1232_v11 }
 0xc8b   :  { %v1090_v18 = vsel %vm36_vm0, %v1086_v17, 0.0  ;;  %v1085_v19 = vadd.f32 %v1077_v16, %v3452_v36  ;;  %v1128_v36 = vld [vmem:[%s4026_s5 + $0x18] sm:$0xff]  ;;  %3106 = vmatpush3.msra.mxu0 %v1232_v11 }
 0xc8c   :  { %1091 = vadd.xlane.f32.xlu1 %v1090_v18  ;;  %3064 = vmatprep.subr.mxu1 %v1128_v36 }
 0xc8d   :  { %v1087_v20 = vsel %vm36_vm0, %v1085_v19, 0.0  ;;  %3065 = vmatpush3.msra.mxu1 %v1128_v36 }
 0xc8e   :  { %1088 = vadd.xlane.f32.xlu0 %v1087_v20  ;;  %3066 = vmatprep.subr.mxu1 %v1127_v34 }
 0xc8f   :  { %3067 = vmatpush3.msra.mxu1 %v1127_v34 }
 0xc90   :  { %3068 = vmatprep.subr.mxu1 %v1126_v35 }
 0xc91   :  { %3069 = vmatpush3.msra.mxu1 %v1126_v35 }
 0xc92   :  { %3070 = vmatprep.subr.mxu1 %v1125_v37 }
 0xc93   :  { %3071 = vmatpush3.msra.mxu1 %v1125_v37 }
 0xd15   :  { %v1092_v21 = vpop.xlane.xlu1 %1091 }
 0xd16   :  { %v1094_v22 = vmul.f32 0.03125, %v1092_v21 }
 0xd17   :  { %v1089_v23 = vpop.xlane.xlu0 %1088 }
 0xd18   :  { %v1093_v24 = vmul.f32 0.03125, %v1089_v23  ;;  %v1096_v29 = vsub.f32 %v1086_v17, %v1094_v22 }
 0xd1a   :  { %v1095_v30 = vsub.f32 %v1085_v19, %v1093_v24  ;;  %v1098_v33 = vmul.f32 %v1096_v29, %v1096_v29 }
 0xd1c   :  { %v1097_v31 = vmul.f32 %v1095_v30, %v1095_v30  ;;  %v1102_v38 = vsel %vm36_vm0, %v1098_v33, 0.0 }
 0xd1e   :  { %v1099_v32 = vsel %vm36_vm0, %v1097_v31, 0.0 }
 0xd1f   :  { %1100 = vadd.xlane.f32.xlu0 %v1099_v32 }
 0xd23   :  { %1103 = vadd.xlane.f32.xlu0 %v1102_v38 }
 0xda8   :  { %v1101_v40 = vpop.xlane.xlu0 %1100 }
 0xda9   :  { %v1105_v41 = vmul.f32 0.03125, %v1101_v40 }
 0xdab   :  { %v1107_v43 = vadd.f32 1e-12, %v1105_v41  ;;  %v3711_v41 = vld [vmem:[%s4023_s2 + $0x8] sm:$0xff] }
 0xdac   :  { %v1104_v45 = vpop.xlane.xlu0 %1103 }
 0xdad   :  { %3295 = vrsqrt.f32 %v1107_v43  ;;  %v1106_v44 = vmul.f32 0.03125, %v1104_v45  ;;  %v1251_v43 = vrot.slane %v3711_v41, %v3438_v26 }
 0xdaf   :  { %v1108_v46 = vadd.f32 1e-12, %v1106_v44 }
 0xdb1   :  { %3297 = vrsqrt.f32 %v1108_v46 }
 0xdba   :  { %v3296_v52 = vpop.eup %3295 }
 0xdbb   :  { %v1111_v53 = vmul.f32 %v3296_v52, %v1095_v30 }
 0xdbd   :  { %v1117_v55 = vmul.f32 %v1116_v51, %v1111_v53 }
 0xdbe   :  { %v3298_v56 = vpop.eup %3297 }
 0xdbf   :  { %v1112_v57 = vmul.f32 %v3298_v56, %v1096_v29  ;;  %v3648_v42 = vadd.f32 %v1122_v54, %v1117_v55 }
 0xdc1   :  { %v1118_v58 = vmul.f32 %v1116_v51, %v1112_v57  ;;  %3072 = vmatprep.mubr.msk.f32.mxu1 %vm36_vm0, %v3648_v42 }
 0xdc3   :  { %v3652_v59 = vadd.f32 %v1122_v54, %v1118_v58 }
 0xdc5   :  { %3073 = vmatmul.mubr.msk.f32.vlgmr.msra.gmra.mxu1 %vm36_vm0, %v3652_v59 }
 0xe85   :  { %v3074_v15 = vpop.f32.mrf.mxu1 }
 0xe86   :  { %v1211_v16 = vadd.f32 %v3074_v15, %v1132_v12  ;;  %v3736_v15 = vsub.s32 2, %v3435_v25 }
 0xe87   :  { %v1205_v17 = vpop.f32.mrf.mxu1 }
 0xe88   :  { %v1217_v18 = vmul.f32 0.044715, %v1211_v16  ;;  %v1206_v19 = vadd.f32 %v1205_v17, %v1132_v12  ;;  %v1215_v35 = vmul.f32 0.5, %v1211_v16  ;;  %v1358_v12 = vrot.slane %v3711_v41, %v3446_v28 }
 0xe8a   :  { %v1219_v20 = vmul.f32 %v1217_v18, %v1211_v16  ;;  %v1216_v21 = vmul.f32 0.044715, %v1206_v19  ;;  %v1214_v27 = vmul.f32 0.5, %v1206_v19 }
 0xe8c   :  { %v1221_v22 = vmul.f32 %v1219_v20, %v1211_v16  ;;  %v1218_v23 = vmul.f32 %v1216_v21, %v1206_v19  ;;  %v1364_v20 = vrot.slane %v3711_v41, %v3736_v15 }
 0xe8e   :  { %v1223_v24 = vadd.f32 %v1221_v22, %v1211_v16  ;;  %v1220_v29 = vmul.f32 %v1218_v23, %v1206_v19 }
 0xe90   :  { %v1222_v30 = vadd.f32 %v1220_v29, %v1206_v19  ;;  %v1225_v31 = vmul.f32 0.7978846, %v1223_v24  ;;  %v1375_v24 = vrot.slane %v3711_v41, %v82_v39 }
 0xe92   :  { %v1224_v32 = vmul.f32 0.7978846, %v1222_v30  ;;  %3299 = vtanh.f32 %v1225_v31 }
 0xe94   :  { %3301 = vtanh.f32 %v1224_v32 }
 0xe9f   :  { %v3300_v33 = vpop.eup %3299 }
 0xea0   :  { %v1229_v36 = vadd.f32 1.0, %v3300_v33 }
 0xea1   :  { %v3302_v38 = vpop.eup %3301 }
 0xea2   :  { %v1228_v34 = vadd.f32 1.0, %v3302_v38  ;;  %v1231_v40 = vmul.f32 %v1229_v36, %v1215_v35 }
 0xea4   :  { %v1230_v37 = vmul.f32 %v1228_v34, %v1214_v27 }
 0xea6   :  { %3107 = vmatprep.mubr.f32.mxu0 %v1230_v37 }
 0xea7   :  { %3108 = vmatmul.mubr.f32.vlgmr.msra.gmra.mxu0 %v1231_v40 }
 0xf67   :  { %v3109_v45 = vpop.f32.mrf.mxu0 }
 0xf68   :  { %v1324_v44 = vadd.f32 %v3109_v45, %v1251_v43 }
 0xf69   :  { %v1318_v46 = vpop.f32.mrf.mxu0 }
 0xf6a   :  { %v1319_v51 = vadd.f32 %v1318_v46, %v1251_v43  ;;  %v1328_v52 = vadd.f32 %v1324_v44, %v3652_v59 }
 0xf6c   :  { %v1332_v53 = vsel %vm36_vm0, %v1328_v52, 0.0  ;;  %v1327_v54 = vadd.f32 %v1319_v51, %v3648_v42  ;;  %v2787_v42 = vld [vmem:[%s4022_s3 + $0x38] sm:$0xff] }
 0xf6d   :  { %1333 = vadd.xlane.f32.xlu1 %v1332_v53  ;;  %3110 = vmatprep.subr.mxu1 %v2787_v42 }
 0xf6e   :  { %v1329_v55 = vsel %vm36_vm0, %v1327_v54, 0.0  ;;  %3111 = vmatpush3.msra.mxu1 %v2787_v42 }
 0xf6f   :  { %1330 = vadd.xlane.f32.xlu0 %v1329_v55  ;;  %3112 = vmatprep.subr.mxu1 %v2786_v2 }
 0xf70   :  { %3113 = vmatpush3.msra.mxu1 %v2786_v2 }
 0xf71   :  { %3114 = vmatprep.subr.mxu1 %v2785_v3 }
 0xf72   :  { %3115 = vmatpush3.msra.mxu1 %v2785_v3 }
 0xf73   :  { %3116 = vmatprep.subr.mxu1 %v2784_v4 }
 0xf74   :  { %3117 = vmatpush3.msra.mxu1 %v2784_v4 }
 0xff6   :  { %v1334_v56 = vpop.xlane.xlu1 %1333 }
 0xff7   :  { %v1336_v57 = vmul.f32 0.03125, %v1334_v56 }
 0xff8   :  { %v1331_v58 = vpop.xlane.xlu0 %1330 }
 0xff9   :  { %v1338_v60 = vsub.f32 %v1328_v52, %v1336_v57  ;;  %v1335_v61 = vmul.f32 0.03125, %v1331_v58 }
 0xffb   :  { %v1337_v62 = vsub.f32 %v1327_v54, %v1335_v61  ;;  %v1340_v63 = vmul.f32 %v1338_v60, %v1338_v60 }
 0xffd   :  { %v1344_v0 = vsel %vm36_vm0, %v1340_v63, 0.0  ;;  %v1339_v1 = vmul.f32 %v1337_v62, %v1337_v62 }
 0xffe   :  { %1345 = vadd.xlane.f32.xlu1 %v1344_v0 }
 0xfff   :  { %v1341_v59 = vsel %vm36_vm0, %v1339_v1, 0.0 }
0x1000   :  { %1342 = vadd.xlane.f32.xlu0 %v1341_v59 }
0x1087   :  { %v1346_v5 = vpop.xlane.xlu1 %1345 }
0x1088   :  { %v1348_v6 = vmul.f32 0.03125, %v1346_v5 }
0x1089   :  { %v1343_v7 = vpop.xlane.xlu0 %1342 }
0x108a   :  { %v1350_v8 = vadd.f32 1e-12, %v1348_v6  ;;  %v1347_v9 = vmul.f32 0.03125, %v1343_v7 }
0x108c   :  { %3303 = vrsqrt.f32 %v1350_v8  ;;  %v1349_v10 = vadd.f32 1e-12, %v1347_v9  ;;  %v3814_v9 = vld [vmem:[%s4024_s1 + $0x8] sm:$0xff] }
0x108e   :  { %3305 = vrsqrt.f32 %v1349_v10 }
0x1099   :  { %v3304_v11 = vpop.eup %3303 }
0x109a   :  { %v1354_v16 = vmul.f32 %v3304_v11, %v1338_v60 }
0x109b   :  { %v3306_v17 = vpop.eup %3305 }
0x109c   :  { %v1353_v18 = vmul.f32 %v3306_v17, %v1337_v62  ;;  %v1360_v19 = vmul.f32 %v1358_v12, %v1354_v16  ;;  %v3820_v16 = vld [vmem:[%s4024_s1] sm:$0xff] }
0x109e   :  { %v1359_v21 = vmul.f32 %v1358_v12, %v1353_v18  ;;  %v3742_v23 = vadd.f32 %v1364_v20, %v1360_v19 }
0x10a0   :  { %v3740_v22 = vadd.f32 %v1364_v20, %v1359_v21 }
0x10a2   :  { %3118 = vmatprep.mubr.msk.f32.mxu1 %vm36_vm0, %v3740_v22 }
0x10a3   :  { %3119 = vmatmul.mubr.msk.f32.vlgmr.msra.gmra.mxu1 %vm36_vm0, %v3742_v23 }
0x1163   :  { %v3120_v29 = vpop.f32.mrf.mxu1 }
0x1164   :  { %v3751_v30 = vadd.f32 %v3120_v29, %v1375_v24 }
0x1165   :  { %v1448_v31 = vpop.f32.mrf.mxu1 }
0x1166   :  { %v3753_v32 = vadd.f32 %v1448_v31, %v1375_v24  ;;  %1461 = vrot.lane.b32.xlu0 %v3751_v30, %s3354_s18 }
0x1168   :  { %1459 = vrot.lane.b32.xlu1 %v3753_v32, %s3354_s18  ;;  %3125 = vmatprep.mubr.msk.f32.mxu1 %vm171_vm1, %v3753_v32 }
0x11d8   :  { %v1462_v33 = vpop.permute.xlu0 %1461 }
0x11d9   :  { %3121 = vmatprep.subr.msk.mxu1 %vm171_vm1, %v1462_v33 }
0x11da   :  { %3122 = vmatpush3.xpose.msk.msra.mxu1 %vm171_vm1, %v1462_v33  ;;  %v1460_v39 = vpop.permute.xlu1 %1459 }
0x11db   :  { %3123 = vmatprep.subr.msk.mxu1 %vm171_vm1, %v1460_v39 }
0x11de   :  { %3124 = vmatpush3.xpose.msk.msra.mxu1 %vm171_vm1, %v1460_v39 }
0x11e1   :  { %3126 = vmatmul.mubr.msk.f32.vlgmr.msra.gmra.mxu1 %vm171_vm1, %v3751_v30 }
0x12a1   :  { %v3127_v38 = vpop.f32.mrf.mxu1 }
0x12a2   :  { %v1543_v36 = vadd.f32 %v3127_v38, %v3483_v47 }
0x12a3   :  { %v1537_v27 = vpop.f32.mrf.mxu1 }
0x12a4   :  { %v1538_v34 = vadd.f32 %v1537_v27, %v3488_v49  ;;  %v1549_v35 = vsel %vm255_vm2, %v1543_v36, -inf }
0x12a5   :  { %1550 = vmax.xlane.f32.xlu0 %v1549_v35 }
0x12a6   :  { %v1546_v37 = vsel %vm255_vm2, %v1538_v34, -inf }
0x12a7   :  { %1547 = vmax.xlane.f32.xlu1 %v1546_v37 }
0x12b8   :  { %1568 = vrot.lane.b32.xlu1 %v3753_v32, %s3355_s23 }
0x12bb   :  { %1570 = vrot.lane.b32.xlu0 %v3751_v30, %s3355_s23 }
0x12bc   :  { %1661 = vrot.lane.b32.xlu1 %v3751_v30, %s3356_s24 }
0x12c0   :  { %1659 = vrot.lane.b32.xlu1 %v3753_v32, %s3356_s24 }
0x132e   :  { %v1551_v47 = vpop.xlane.xlu0 %1550 }
0x132f   :  { %v1553_v49 = vsub.f32 %v1543_v36, %v1551_v47 }
0x1330   :  { %v1548_v40 = vpop.xlane.xlu1 %1547 }
0x1331   :  { %v1556_v43 = vmul.f32 1.442695, %v1553_v49  ;;  %v1552_v45 = vsub.f32 %v1538_v34, %v1548_v40 }
0x1332   :  { %v1571_v44 = vpop.permute.xlu0 %1570 }
0x1333   :  { %3307 = vpow2.f32 %v1556_v43  ;;  %v1554_v46 = vmul.f32 1.442695, %v1552_v45  ;;  %3128 = vmatprep.subr.mxu1 %v1571_v44 }
0x1334   :  { %3129 = vmatpush3.msra.mxu1 %v1571_v44  ;;  %v1569_v51 = vpop.permute.xlu1 %1568 }
0x1335   :  { %3309 = vpow2.f32 %v1554_v46  ;;  %3130 = vmatprep.subr.mxu1 %v1569_v51 }
0x1336   :  { %3131 = vmatpush3.msra.mxu1 %v1569_v51 }
0x1338   :  { %v1662_v52 = vpop.permute.xlu1 %1661 }
0x1339   :  { %3135 = vmatprep.subr.msk.mxu1 %vm171_vm1, %v1662_v52 }
0x133c   :  { %v1660_v57 = vpop.permute.xlu1 %1659 }
0x1340   :  { %v3308_v53 = vpop.eup %3307 }
0x1341   :  { %v1561_v54 = vsel %vm255_vm2, %v3308_v53, 0.0 }
0x1342   :  { %v3310_v55 = vpop.eup %3309  ;;  %1562 = vadd.xlane.f32.xlu1 %v1561_v54 }
0x1343   :  { %v1558_v56 = vsel %vm255_vm2, %v3310_v55, 0.0 }
0x1344   :  { %1559 = vadd.xlane.f32.xlu0 %v1558_v56 }
0x1353   :  { %1655 = vrot.lane.b32.xlu1 %v3753_v32, %s3357_s25 }
0x1357   :  { %1859 = vrot.lane.b32.xlu1 %v3753_v32, %s3359_s27 }
0x135a   :  { %1861 = vrot.lane.b32.xlu0 %v3751_v30, %s3359_s27 }
0x135b   :  { %1857 = vrot.lane.b32.xlu1 %v3751_v30, %s3360_s28 }
0x135e   :  { %1657 = vrot.lane.b32.xlu0 %v3751_v30, %s3357_s25 }
0x1362   :  { %1855 = vrot.lane.b32.xlu0 %v3753_v32, %s3360_s28 }
0x13cb   :  { %v1563_v58 = vpop.xlane.xlu1 %1562 }
0x13cc   :  { %3311 = vrcp.f32 %v1563_v58 }
0x13cd   :  { %v1560_v60 = vpop.xlane.xlu0 %1559 }
0x13ce   :  { %3313 = vrcp.f32 %v1560_v60 }
0x13cf   :  { %v1656_v61 = vpop.permute.xlu1 %1655 }
0x13d1   :  { %v1862_v62 = vpop.permute.xlu0 %1861 }
0x13d2   :  { %3149 = vmatprep.subr.msk.mxu0 %vm171_vm1, %v1862_v62 }
0x13d3   :  { %3150 = vmatpush3.xpose.msk.msra.mxu0 %vm171_vm1, %v1862_v62  ;;  %v1860_v63 = vpop.permute.xlu1 %1859 }
0x13d4   :  { %3151 = vmatprep.subr.msk.mxu0 %vm171_vm1, %v1860_v63 }
0x13d5   :  { %v1658_v0 = vpop.permute.xlu0 %1657 }
0x13d7   :  { %3152 = vmatpush3.xpose.msk.msra.mxu0 %vm171_vm1, %v1860_v63  ;;  %v1858_v42 = vpop.permute.xlu1 %1857 }
0x13d9   :  { %v1856_v1 = vpop.permute.xlu0 %1855  ;;  %v3312_v59 = vpop.eup %3311 }
0x13da   :  { %3153 = vmatprep.mubr.msk.f32.mxu0 %vm171_vm1, %v1856_v1  ;;  %v1567_v4 = vmul.f32 %v3312_v59, %v3308_v53 }
0x13db   :  { %v3314_v2 = vpop.eup %3313  ;;  %3154 = vmatmul.mubr.msk.f32.vlgmr.msra.gmra.mxu0 %vm171_vm1, %v1858_v42 }
0x13dc   :  { %v1566_v3 = vmul.f32 %v3314_v2, %v3310_v55 }
0x13de   :  { %3132 = vmatprep.mubr.msk.f32.mxu1 %vm255_vm2, %v1566_v3 }
0x13df   :  { %3133 = vmatmul.mubr.msk.f32.vlgmr.msra.gmra.mxu1 %vm255_vm2, %v1567_v4 }
0x13e0   :  { %3136 = vmatpush3.xpose.msk.msra.mxu1 %vm171_vm1, %v1662_v52  ;;  %3139 = vmatprep.mubr.msk.f32.mxu1 %vm171_vm1, %v1656_v61 }
0x13e1   :  { %3137 = vmatprep.subr.msk.mxu1 %vm171_vm1, %v1660_v57 }
0x13e4   :  { %3138 = vmatpush3.xpose.msk.msra.mxu1 %vm171_vm1, %v1660_v57 }
0x13e7   :  { %3140 = vmatmul.mubr.msk.f32.vlgmr.msra.gmra.mxu1 %vm171_vm1, %v1658_v0 }
0x149b   :  { %v3155_v6 = vpop.f32.mrf.mxu0 }
0x149c   :  { %v1943_v21 = vadd.f32 %v3814_v9, %v3155_v6 }
0x149d   :  { %v1937_v11 = vpop.f32.mrf.mxu0 }
0x149e   :  { %v1938_v19 = vadd.f32 %v3820_v16, %v1937_v11  ;;  %v1949_v29 = vsel %vm255_vm2, %v1943_v21, -inf }
0x149f   :  { %v3807_v5 = vpop.f32.mrf.mxu1 }
0x14a0   :  { %v1946_v24 = vsel %vm255_vm2, %v1938_v19, -inf }
0x14a1   :  { %v3809_v7 = vpop.f32.mrf.mxu1 }
0x14a7   :  { %v3141_v8 = vpop.f32.mrf.mxu1 }
0x14a8   :  { %v1743_v10 = vadd.f32 %v3814_v9, %v3141_v8 }
0x14a9   :  { %v1737_v12 = vpop.f32.mrf.mxu1 }
0x14aa   :  { %v1738_v17 = vadd.f32 %v3820_v16, %v1737_v12  ;;  %v1749_v18 = vsel %vm255_vm2, %v1743_v10, -inf }
0x14ab   :  { %1750 = vmax.xlane.f32.xlu1 %v1749_v18 }
0x14ac   :  { %v1746_v20 = vsel %vm255_vm2, %v1738_v17, -inf }
0x14ad   :  { %1747 = vmax.xlane.f32.xlu0 %v1746_v20 }
0x14b1   :  { %1947 = vmax.xlane.f32.xlu0 %v1946_v24 }
0x14b5   :  { %1950 = vmax.xlane.f32.xlu0 %v1949_v29 }
0x1534   :  { %v1751_v39 = vpop.xlane.xlu1 %1750 }
0x1535   :  { %v1753_v27 = vsub.f32 %v1743_v10, %v1751_v39 }
0x1536   :  { %v1748_v31 = vpop.xlane.xlu0 %1747 }
0x1537   :  { %v1752_v33 = vsub.f32 %v1738_v17, %v1748_v31  ;;  %v1756_v49 = vmul.f32 1.442695, %v1753_v27 }
0x1539   :  { %v1754_v34 = vmul.f32 1.442695, %v1752_v33 }
0x153a   :  { %v1948_v38 = vpop.xlane.xlu0 %1947 }
0x153b   :  { %v1952_v36 = vsub.f32 %v1938_v19, %v1948_v38 }
0x153d   :  { %v1954_v35 = vmul.f32 1.442695, %v1952_v36 }
0x153e   :  { %v1951_v37 = vpop.xlane.xlu0 %1950 }
0x153f   :  { %3315 = vpow2.f32 %v1954_v35  ;;  %v1953_v47 = vsub.f32 %v1943_v21, %v1951_v37 }
0x1540   :  { %3317 = vpow2.f32 %v1754_v34 }
0x1541   :  { %v1956_v40 = vmul.f32 1.442695, %v1953_v47 }
0x1543   :  { %3319 = vpow2.f32 %v1956_v40 }
0x1544   :  { %3321 = vpow2.f32 %v1756_v49 }
0x154c   :  { %v3316_v43 = vpop.eup %3315 }
0x154d   :  { %v1958_v45 = vsel %vm255_vm2, %v3316_v43, 0.0  ;;  %v3318_v44 = vpop.eup %3317 }
0x154e   :  { %1959 = vadd.xlane.f32.xlu0 %v1958_v45  ;;  %v1758_v51 = vsel %vm255_vm2, %v3318_v44, 0.0 }
0x1550   :  { %v3320_v46 = vpop.eup %3319 }
0x1551   :  { %v1961_v52 = vsel %vm255_vm2, %v3320_v46, 0.0  ;;  %v3322_v53 = vpop.eup %3321 }
0x1552   :  { %1759 = vadd.xlane.f32.xlu0 %v1758_v51  ;;  %1962 = vadd.xlane.f32.xlu1 %v1961_v52  ;;  %v1761_v54 = vsel %vm255_vm2, %v3322_v53, 0.0 }
0x1556   :  { %1762 = vadd.xlane.f32.xlu1 %v1761_v54  ;;  %v2815_v54 = vld [vmem:[%s4025_s4 + $0x28] sm:$0xff] }
0x1567   :  { %1768 = vrot.lane.b32.xlu1 %v3753_v32, %s3358_s26 }
0x1568   :  { %1770 = vrot.lane.b32.xlu0 %v3751_v30, %s3358_s26 }
0x156b   :  { %1970 = vrot.lane.b32.xlu1 %v3751_v30, %s3361_s29 }
0x156c   :  { %2061 = vrot.lane.b32.xlu0 %v3751_v30, %s3362_s30 }
0x156f   :  { %1968 = vrot.lane.b32.xlu1 %v3753_v32, %s3361_s29 }
0x1570   :  { %2055 = vrot.lane.b32.xlu0 %v3753_v32, %s3363_s0 }
0x1573   :  { %2059 = vrot.lane.b32.xlu1 %v3753_v32, %s3362_s30 }
0x1577   :  { %2057 = vrot.lane.b32.xlu1 %v3751_v30, %s3363_s0 }
0x15d7   :  { %v1960_v55 = vpop.xlane.xlu0 %1959 }
0x15db   :  { %v1760_v56 = vpop.xlane.xlu0 %1759  ;;  %v1963_v57 = vpop.xlane.xlu1 %1962 }
0x15dc   :  { %3323 = vrcp.f32 %v1760_v56 }
0x15dd   :  { %3325 = vrcp.f32 %v1960_v55  ;;  %v2814_v55 = vld [vmem:[%s4025_s4 + $0x20] sm:$0xff] }
0x15df   :  { %v1771_v58 = vpop.permute.xlu0 %1770  ;;  %v1763_v60 = vpop.xlane.xlu1 %1762 }
0x15e0   :  { %3327 = vrcp.f32 %v1763_v60  ;;  %3142 = vmatprep.subr.mxu1 %v1771_v58 }
0x15e1   :  { %3143 = vmatpush3.msra.mxu1 %v1771_v58  ;;  %3329 = vrcp.f32 %v1963_v57 }
0x15e3   :  { %v1769_v61 = vpop.permute.xlu1 %1768  ;;  %v2062_v42 = vpop.permute.xlu0 %2061 }
0x15e4   :  { %3144 = vmatprep.subr.mxu1 %v1769_v61 }
0x15e5   :  { %3145 = vmatpush3.msra.mxu1 %v1769_v61 }
0x15e7   :  { %v1971_v62 = vpop.permute.xlu1 %1970  ;;  %v2056_v10 = vpop.permute.xlu0 %2055 }
0x15e8   :  { %3156 = vmatprep.subr.mxu1 %v1971_v62 }
0x15e9   :  { %v3324_v63 = vpop.eup %3323 }
0x15ea   :  { %v1766_v0 = vmul.f32 %v3324_v63, %v3318_v44  ;;  %v3326_v1 = vpop.eup %3325 }
0x15eb   :  { %v1969_v4 = vpop.permute.xlu1 %1968  ;;  %v1966_v6 = vmul.f32 %v3326_v1, %v3316_v43 }
0x15ec   :  { %3146 = vmatprep.mubr.msk.f32.mxu1 %vm255_vm2, %v1766_v0 }
0x15ed   :  { %v3328_v59 = vpop.eup %3327 }
0x15ee   :  { %v1767_v2 = vmul.f32 %v3328_v59, %v3322_v53  ;;  %v3330_v3 = vpop.eup %3329  ;;  %v2816_v53 = vld [vmem:[%s4025_s4 + $0x30] sm:$0xff] }
0x15ef   :  { %v1967_v8 = vmul.f32 %v3330_v3, %v3320_v46  ;;  %v2060_v11 = vpop.permute.xlu1 %2059 }
0x15f0   :  { %3147 = vmatmul.mubr.msk.f32.vlgmr.msra.gmra.mxu1 %vm255_vm2, %v1767_v2 }
0x15f1   :  { %3157 = vmatpush3.msra.mxu1 %v1971_v62  ;;  %3160 = vmatprep.mubr.msk.f32.mxu1 %vm255_vm2, %v1966_v6 }
0x15f2   :  { %3158 = vmatprep.subr.mxu1 %v1969_v4 }
0x15f3   :  { %3159 = vmatpush3.msra.mxu1 %v1969_v4  ;;  %v2058_v12 = vpop.permute.xlu1 %2057 }
0x15f4   :  { %3163 = vmatprep.subr.msk.mxu1 %vm171_vm1, %v2062_v42  ;;  %3161 = vmatmul.mubr.msk.f32.vlgmr.msra.gmra.mxu1 %vm255_vm2, %v1967_v8 }
0x15f5   :  { %3164 = vmatpush3.xpose.msk.msra.mxu1 %vm171_vm1, %v2062_v42  ;;  %3167 = vmatprep.mubr.msk.f32.mxu1 %vm171_vm1, %v2056_v10 }
0x15f6   :  { %3165 = vmatprep.subr.msk.mxu1 %vm171_vm1, %v2060_v11 }
0x15f9   :  { %3166 = vmatpush3.xpose.msk.msra.mxu1 %vm171_vm1, %v2060_v11 }
0x15fc   :  { %3168 = vmatmul.mubr.msk.f32.vlgmr.msra.gmra.mxu1 %vm171_vm1, %v2058_v12 }
0x16b0   :  { %v3148_v17 = vpop.f32.mrf.mxu1 }
0x16b2   :  { %v1846_v18 = vpop.f32.mrf.mxu1 }
0x16b4   :  { %v3162_v19 = vpop.f32.mrf.mxu1 }
0x16b6   :  { %v2046_v20 = vpop.f32.mrf.mxu1 }
0x16bc   :  { %v3169_v21 = vpop.f32.mrf.mxu1 }
0x16bd   :  { %v2143_v24 = vadd.f32 %v3814_v9, %v3169_v21 }
0x16be   :  { %v2137_v29 = vpop.f32.mrf.mxu1 }
0x16bf   :  { %v2138_v31 = vadd.f32 %v3820_v16, %v2137_v29  ;;  %v2149_v33 = vsel %vm255_vm2, %v2143_v24, -inf }
0x16c0   :  { %2150 = vmax.xlane.f32.xlu1 %v2149_v33 }
0x16c1   :  { %v2146_v39 = vsel %vm255_vm2, %v2138_v31, -inf }
0x16c2   :  { %2147 = vmax.xlane.f32.xlu0 %v2146_v39 }
0x16d1   :  { %2168 = vrot.lane.b32.xlu1 %v3753_v32, %s3364_s9 }
0x16d5   :  { %2257 = vrot.lane.b32.xlu1 %v1846_v18, %s3365_s10 }
0x16d9   :  { %2259 = vrot.lane.b32.xlu1 %v3148_v17, %s3365_s10 }
0x16dd   :  { %2267 = vrot.lane.b32.xlu1 %v3162_v19, %s3366_s11 }
0x1749   :  { %v2151_v38 = vpop.xlane.xlu1 %2150 }
0x174a   :  { %v2153_v9 = vsub.f32 %v2143_v24, %v2151_v38  ;;  %v2822_v38 = vld [vmem:[%s4026_s5 + $0x30] sm:$0xff] }
0x174b   :  { %v2148_v36 = vpop.xlane.xlu0 %2147 }
0x174c   :  { %v2156_v27 = vmul.f32 1.442695, %v2153_v9  ;;  %v2152_v16 = vsub.f32 %v2138_v31, %v2148_v36  ;;  %v2821_v9 = vld [vmem:[%s4026_s5 + $0x28] sm:$0xff]  ;;  %v2820_v36 = vld [vmem:[%s4026_s5 + $0x20] sm:$0xff] }
0x174d   :  { %v2169_v45 = vpop.permute.xlu1 %2168 }
0x174e   :  { %3331 = vpow2.f32 %v2156_v27  ;;  %v2154_v34 = vmul.f32 1.442695, %v2152_v16 }
0x1750   :  { %3333 = vpow2.f32 %v2154_v34 }
0x1751   :  { %v2258_v58 = vpop.permute.xlu1 %2257 }
0x1752   :  { %v2279_v63 = vsel %vm171_vm1, %v3809_v7, %v2258_v58  ;;  %v2293_v7 = vrot.slane %v3711_v41, %v1002_v14  ;;  %v2834_v58 = vld [vmem:[%s4027_s6 + $0xc0] sm:$0xff] }
0x1755   :  { %v2260_v60 = vpop.permute.xlu1 %2259 }
0x1756   :  { %v2280_v1 = vsel %vm171_vm1, %v3807_v5, %v2260_v60  ;;  %v2833_v60 = vld [vmem:[%s4027_s6 + $0xb8] sm:$0xff] }
0x1759   :  { %v2268_v61 = vpop.permute.xlu1 %2267 }
0x175a   :  { %v2282_v2 = vsel %vm255_vm2, %v2280_v1, %v2268_v61  ;;  %v2832_v61 = vld [vmem:[%s4027_s6 + $0xb0] sm:$0xff] }
0x175b   :  { %v3332_v35 = vpop.eup %3331  ;;  %v2828_v1 = vld [vmem:[%s4027_s6 + $0x90] sm:$0xff] }
0x175c   :  { %v2161_v37 = vsel %vm255_vm2, %v3332_v35, 0.0 }
0x175d   :  { %v3334_v47 = vpop.eup %3333  ;;  %2162 = vadd.xlane.f32.xlu0 %v2161_v37 }
0x175e   :  { %v2158_v32 = vsel %vm255_vm2, %v3334_v47, 0.0 }
0x1761   :  { %2159 = vadd.xlane.f32.xlu0 %v2158_v32  ;;  %v2406_v32 = vrot.slane %v3711_v41, %v1115_v48  ;;  %v2841_v48 = vld [vmem:[%s4027_s6 + $0xf8] sm:$0xff] }
0x1777   :  { %2170 = vrot.lane.b32.xlu0 %v3751_v30, %s3364_s9  ;;  %v2817_v30 = vld [vmem:[%s4025_s4 + $0x38] sm:$0xff] }
0x177b   :  { %2265 = vrot.lane.b32.xlu0 %v2046_v20, %s3366_s11 }
0x17e6   :  { %v2163_v49 = vpop.xlane.xlu0 %2162 }
0x17e7   :  { %3335 = vrcp.f32 %v2163_v49 }
0x17ea   :  { %v2160_v40 = vpop.xlane.xlu0 %2159 }
0x17eb   :  { %3337 = vrcp.f32 %v2160_v40 }
0x17ee   :  { %v2171_v43 = vpop.permute.xlu0 %2170 }
0x17ef   :  { %3170 = vmatprep.subr.mxu0 %v2171_v43 }
0x17f0   :  { %3171 = vmatpush3.msra.mxu0 %v2171_v43  ;;  %v2412_v43 = vrot.slane %v3711_v41, %v1121_v50  ;;  %v2840_v50 = vld [vmem:[%s4027_s6 + $0xf0] sm:$0xff] }
0x17f1   :  { %3172 = vmatprep.subr.mxu0 %v2169_v45 }
0x17f2   :  { %3173 = vmatpush3.msra.mxu0 %v2169_v45  ;;  %v2266_v62 = vpop.permute.xlu0 %2265 }
0x17f3   :  { %3177 = vmatprep.subr.mxu0 %v2817_v30  ;;  %v2281_v59 = vsel %vm255_vm2, %v2279_v63, %v2266_v62  ;;  %v2831_v62 = vld [vmem:[%s4027_s6 + $0xa8] sm:$0xff]  ;;  %v2830_v63 = vld [vmem:[%s4027_s6 + $0xa0] sm:$0xff] }
0x17f4   :  { %v3336_v44 = vpop.eup %3335 }
0x17f5   :  { %v2167_v52 = vmul.f32 %v3336_v44, %v3332_v35 }
0x17f8   :  { %v3338_v46 = vpop.eup %3337 }
0x17f9   :  { %v2166_v51 = vmul.f32 %v3338_v46, %v3334_v47 }
0x17fb   :  { %3174 = vmatprep.mubr.msk.f32.mxu0 %vm255_vm2, %v2166_v51 }
0x17fc   :  { %3175 = vmatmul.mubr.msk.f32.vlgmr.msra.gmra.mxu0 %vm255_vm2, %v2167_v52 }
0x17fd   :  { %3178 = vmatpush3.msra.mxu0 %v2817_v30 }
0x17fe   :  { %3179 = vmatprep.subr.mxu0 %v2816_v53 }
0x17ff   :  { %3180 = vmatpush3.msra.mxu0 %v2816_v53  ;;  %v2839_v53 = vld [vmem:[%s4027_s6 + $0xe8] sm:$0xff] }
0x1800   :  { %3181 = vmatprep.subr.mxu0 %v2815_v54 }
0x1801   :  { %3182 = vmatpush3.msra.mxu0 %v2815_v54  ;;  %v2838_v54 = vld [vmem:[%s4027_s6 + $0xe0] sm:$0xff] }
0x1802   :  { %3183 = vmatprep.subr.mxu0 %v2814_v55 }
0x1803   :  { %3184 = vmatpush3.msra.mxu0 %v2814_v55  ;;  %v2837_v55 = vld [vmem:[%s4027_s6 + $0xd8] sm:$0xff] }
0x1804   :  { %3199 = vmatprep.subr.mxu0 %v2841_v48 }
0x18bc   :  { %v3176_v56 = vpop.f32.mrf.mxu0 }
0x18bd   :  { %2275 = vrot.lane.b32.xlu1 %v3176_v56, %s3367_s21  ;;  %v2836_v56 = vld [vmem:[%s4027_s6 + $0xd0] sm:$0xff] }
0x18be   :  { %v2246_v57 = vpop.f32.mrf.mxu0 }
0x18bf   :  { %2273 = vrot.lane.b32.xlu0 %v2246_v57, %s3367_s21  ;;  %v2835_v57 = vld [vmem:[%s4027_s6 + $0xc8] sm:$0xff] }
0x192f   :  { %v2276_v0 = vpop.permute.xlu1 %2275 }
0x1930   :  { %v2284_v4 = vsel %vm993_vm3, %v2282_v2, %v2276_v0  ;;  %v2829_v0 = vld [vmem:[%s4027_s6 + $0x98] sm:$0xff]  ;;  %v2423_v2 = vrot.slane %v3711_v41, %v1131_v13 }
0x1931   :  { %v2274_v42 = vpop.permute.xlu0 %2273 }
0x1932   :  { %v2283_v3 = vsel %vm993_vm3, %v2281_v59, %v2274_v42  ;;  %v2827_v59 = vld [vmem:[%s4027_s6 + $0x88] sm:$0xff]  ;;  %v2826_v42 = vld [vmem:[%s4027_s6 + $0x80] sm:$0xff] }
0x1933   :  { %3185 = vmatprep.mubr.msk.f32.mxu0 %vm36_vm0, %v2283_v3 }
0x1934   :  { %3186 = vmatmul.mubr.msk.f32.vlgmr.msra.gmra.mxu0 %vm36_vm0, %v2284_v4 }
0x1935   :  { %3200 = vmatpush3.msra.mxu0 %v2841_v48  ;;  %v2659_v48 = vld [vmem:[%s4028_s7] sm:$0xff] }
0x1936   :  { %3201 = vmatprep.subr.mxu0 %v2840_v50 }
0x1937   :  { %3202 = vmatpush3.msra.mxu0 %v2840_v50 }
0x1938   :  { %3203 = vmatprep.subr.mxu0 %v2839_v53 }
0x1939   :  { %3204 = vmatpush3.msra.mxu0 %v2839_v53 }
0x193a   :  { %3205 = vmatprep.subr.mxu0 %v2838_v54 }
0x193b   :  { %3206 = vmatpush3.msra.mxu0 %v2838_v54 }
0x193c   :  { %3207 = vmatprep.subr.mxu0 %v2837_v55 }
0x193d   :  { %3208 = vmatpush3.msra.mxu0 %v2837_v55 }
0x193e   :  { %3209 = vmatprep.subr.mxu0 %v2836_v56 }
0x193f   :  { %3210 = vmatpush3.msra.mxu0 %v2836_v56 }
0x1940   :  { %3211 = vmatprep.subr.mxu0 %v2835_v57 }
0x1941   :  { %3212 = vmatpush3.msra.mxu0 %v2835_v57 }
0x1942   :  { %3213 = vmatprep.subr.mxu0 %v2834_v58 }
0x1943   :  { %3214 = vmatpush3.msra.mxu0 %v2834_v58 }
0x1944   :  { %3215 = vmatprep.subr.mxu0 %v2833_v60 }
0x1945   :  { %3216 = vmatpush3.msra.mxu0 %v2833_v60 }
0x1946   :  { %3217 = vmatprep.subr.mxu0 %v2832_v61 }
0x1947   :  { %3218 = vmatpush3.msra.mxu0 %v2832_v61 }
0x1948   :  { %3219 = vmatprep.subr.mxu0 %v2831_v62 }
0x1949   :  { %3220 = vmatpush3.msra.mxu0 %v2831_v62 }
0x194a   :  { %3221 = vmatprep.subr.mxu0 %v2830_v63 }
0x194b   :  { %3222 = vmatpush3.msra.mxu0 %v2830_v63 }
0x194c   :  { %3223 = vmatprep.subr.mxu0 %v2829_v0 }
0x194d   :  { %3224 = vmatpush3.msra.mxu0 %v2829_v0 }
0x194e   :  { %3225 = vmatprep.subr.mxu0 %v2828_v1 }
0x194f   :  { %3226 = vmatpush3.msra.mxu0 %v2828_v1 }
0x1950   :  { %3227 = vmatprep.subr.mxu0 %v2827_v59 }
0x1951   :  { %3228 = vmatpush3.msra.mxu0 %v2827_v59 }
0x1952   :  { %3229 = vmatprep.subr.mxu0 %v2826_v42 }
0x1953   :  { %3230 = vmatpush3.msra.mxu0 %v2826_v42 }
0x19f4   :  { %v3187_v6 = vpop.f32.mrf.mxu0 }
0x19f5   :  { %v2372_v8 = vadd.f32 %v3187_v6, %v2293_v7 }
0x19f6   :  { %v2366_v5 = vpop.f32.mrf.mxu0 }
0x19f7   :  { %v2376_v10 = vadd.f32 %v2372_v8, %v3742_v23  ;;  %v2367_v11 = vadd.f32 %v2366_v5, %v2293_v7 }
0x19f9   :  { %v2375_v12 = vadd.f32 %v2367_v11, %v3740_v22  ;;  %v2380_v17 = vsel %vm36_vm0, %v2376_v10, 0.0  ;;  %v2823_v22 = vld [vmem:[%s4026_s5 + $0x38] sm:$0xff] }
0x19fa   :  { %2381 = vadd.xlane.f32.xlu1 %v2380_v17  ;;  %3188 = vmatprep.subr.mxu1 %v2823_v22 }
0x19fb   :  { %v2377_v18 = vsel %vm36_vm0, %v2375_v12, 0.0  ;;  %3189 = vmatpush3.msra.mxu1 %v2823_v22 }
0x19fc   :  { %2378 = vadd.xlane.f32.xlu0 %v2377_v18  ;;  %3190 = vmatprep.subr.mxu1 %v2822_v38 }
0x19fd   :  { %3191 = vmatpush3.msra.mxu1 %v2822_v38 }
0x19fe   :  { %3192 = vmatprep.subr.mxu1 %v2821_v9 }
0x19ff   :  { %3193 = vmatpush3.msra.mxu1 %v2821_v9 }
0x1a00   :  { %3194 = vmatprep.subr.mxu1 %v2820_v36 }
0x1a01   :  { %3195 = vmatpush3.msra.mxu1 %v2820_v36 }
0x1a83   :  { %v2382_v19 = vpop.xlane.xlu1 %2381 }
0x1a84   :  { %v2384_v20 = vmul.f32 0.03125, %v2382_v19 }
0x1a85   :  { %v2379_v21 = vpop.xlane.xlu0 %2378 }
0x1a86   :  { %v2383_v24 = vmul.f32 0.03125, %v2379_v21  ;;  %v2386_v29 = vsub.f32 %v2376_v10, %v2384_v20 }
0x1a88   :  { %v2385_v14 = vsub.f32 %v2375_v12, %v2383_v24  ;;  %v2388_v39 = vmul.f32 %v2386_v29, %v2386_v29 }
0x1a8a   :  { %v2387_v31 = vmul.f32 %v2385_v14, %v2385_v14  ;;  %v2392_v23 = vsel %vm36_vm0, %v2388_v39, 0.0  ;;  %v31_v39 = vld [vmem:[%s4023_s2 + $0x10] sm:$0xff] }
0x1a8b   :  { %v2650_v60 = vrot.slane %v31_v39, %v3446_v28  ;;  %v2656_v0 = vrot.slane %v31_v39, %v3736_v15 }
0x1a8c   :  { %v2389_v33 = vsel %vm36_vm0, %v2387_v31, 0.0 }
0x1a8d   :  { %2390 = vadd.xlane.f32.xlu0 %v2389_v33 }
0x1a91   :  { %2393 = vadd.xlane.f32.xlu0 %v2392_v23  ;;  %v2543_v23 = vrot.slane %v31_v39, %v3438_v26 }
0x1b16   :  { %v2391_v27 = vpop.xlane.xlu0 %2390 }
0x1b17   :  { %v2395_v16 = vmul.f32 0.03125, %v2391_v27 }
0x1b19   :  { %v2397_v34 = vadd.f32 1e-12, %v2395_v16 }
0x1b1a   :  { %v2394_v35 = vpop.xlane.xlu0 %2393 }
0x1b1b   :  { %3339 = vrsqrt.f32 %v2397_v34  ;;  %v2396_v37 = vmul.f32 0.03125, %v2394_v35 }
0x1b1d   :  { %v2398_v47 = vadd.f32 1e-12, %v2396_v37 }
0x1b1f   :  { %3341 = vrsqrt.f32 %v2398_v47 }
0x1b28   :  { %v3340_v49 = vpop.eup %3339 }
0x1b29   :  { %v2401_v40 = vmul.f32 %v3340_v49, %v2385_v14 }
0x1b2b   :  { %v2407_v45 = vmul.f32 %v2406_v32, %v2401_v40 }
0x1b2c   :  { %v3342_v44 = vpop.eup %3341 }
0x1b2d   :  { %v2402_v46 = vmul.f32 %v3342_v44, %v2386_v29  ;;  %v3926_v51 = vadd.f32 %v2412_v43, %v2407_v45 }
0x1b2f   :  { %v2408_v52 = vmul.f32 %v2406_v32, %v2402_v46  ;;  %3196 = vmatprep.mubr.msk.f32.mxu1 %vm36_vm0, %v3926_v51 }
0x1b31   :  { %v3930_v30 = vadd.f32 %v2412_v43, %v2408_v52  ;;  %v2661_v52 = vld [vmem:[%s4028_s7 + $0x10] sm:$0xff] }
0x1b33   :  { %3197 = vmatmul.mubr.msk.f32.vlgmr.msra.gmra.mxu1 %vm36_vm0, %v3930_v30 }
0x1bf3   :  { %v3198_v3 = vpop.f32.mrf.mxu1 }
0x1bf4   :  { %v2502_v4 = vadd.f32 %v3198_v3, %v2423_v2  ;;  %v3353_v3 = vld [vmem:[%s4023_s2] sm:$0xff] }
0x1bf5   :  { %v2496_v7 = vpop.f32.mrf.mxu1 }
0x1bf6   :  { %v2508_v6 = vmul.f32 0.044715, %v2502_v4  ;;  %v2497_v8 = vadd.f32 %v2496_v7, %v2423_v2  ;;  %v2506_v14 = vmul.f32 0.5, %v2502_v4 }
0x1bf8   :  { %v2510_v5 = vmul.f32 %v2508_v6, %v2502_v4  ;;  %v2507_v10 = vmul.f32 0.044715, %v2497_v8  ;;  %v2505_v13 = vmul.f32 0.5, %v2497_v8 }
0x1bfa   :  { %v2512_v11 = vmul.f32 %v2510_v5, %v2502_v4  ;;  %v2509_v12 = vmul.f32 %v2507_v10, %v2497_v8 }
0x1bfc   :  { %v2514_v17 = vadd.f32 %v2512_v11, %v2502_v4  ;;  %v2511_v18 = vmul.f32 %v2509_v12, %v2497_v8  ;;  %v2666_v4 = vrot.slane %v3353_v3, %v3736_v15 }
0x1bfe   :  { %v2513_v19 = vadd.f32 %v2511_v18, %v2497_v8  ;;  %v2516_v20 = vmul.f32 0.7978846, %v2514_v17 }
0x1c00   :  { %v2515_v21 = vmul.f32 0.7978846, %v2513_v19  ;;  %3343 = vtanh.f32 %v2516_v20 }
0x1c02   :  { %3345 = vtanh.f32 %v2515_v21 }
0x1c0d   :  { %v3344_v24 = vpop.eup %3343 }
0x1c0e   :  { %v2520_v29 = vadd.f32 1.0, %v3344_v24 }
0x1c0f   :  { %v3346_v25 = vpop.eup %3345 }
0x1c10   :  { %v2519_v41 = vadd.f32 1.0, %v3346_v25  ;;  %v2522_v33 = vmul.f32 %v2520_v29, %v2506_v14 }
0x1c12   :  { %v2521_v31 = vmul.f32 %v2519_v41, %v2505_v13 }
0x1c14   :  { %3231 = vmatprep.mubr.f32.mxu0 %v2521_v31 }
0x1c15   :  { %3232 = vmatmul.mubr.f32.vlgmr.msra.gmra.mxu0 %v2522_v33 }
0x1cd5   :  { %v3233_v22 = vpop.f32.mrf.mxu0 }
0x1cd6   :  { %v2616_v38 = vadd.f32 %v3233_v22, %v2543_v23 }
0x1cd7   :  { %v2610_v9 = vpop.f32.mrf.mxu0 }
0x1cd8   :  { %v2620_v36 = vadd.f32 %v2616_v38, %v3930_v30  ;;  %v2611_v27 = vadd.f32 %v2610_v9, %v2543_v23  ;;  %v2660_v30 = vld [vmem:[%s4028_s7 + $0x8] sm:$0xff] }
0x1cda   :  { %v2619_v16 = vadd.f32 %v2611_v27, %v3926_v51  ;;  %v2624_v34 = vsel %vm36_vm0, %v2620_v36, 0.0  ;;  %v2662_v51 = vld [vmem:[%s4028_s7 + $0x18] sm:$0xff] }
0x1cdb   :  { %2625 = vadd.xlane.f32.xlu1 %v2624_v34  ;;  %3234 = vmatprep.subr.mxu1 %v2662_v51 }
0x1cdc   :  { %v2621_v35 = vsel %vm36_vm0, %v2619_v16, 0.0  ;;  %3235 = vmatpush3.msra.mxu1 %v2662_v51 }
0x1cdd   :  { %2622 = vadd.xlane.f32.xlu0 %v2621_v35  ;;  %3236 = vmatprep.subr.mxu1 %v2661_v52 }
0x1cde   :  { %3237 = vmatpush3.msra.mxu1 %v2661_v52 }
0x1cdf   :  { %3238 = vmatprep.subr.mxu1 %v2660_v30 }
0x1ce0   :  { %3239 = vmatpush3.msra.mxu1 %v2660_v30 }
0x1ce1   :  { %3240 = vmatprep.subr.mxu1 %v2659_v48 }
0x1ce2   :  { %3241 = vmatpush3.msra.mxu1 %v2659_v48 }
0x1d64   :  { %v2626_v37 = vpop.xlane.xlu1 %2625 }
0x1d65   :  { %v2628_v47 = vmul.f32 0.03125, %v2626_v37 }
0x1d66   :  { %v2623_v32 = vpop.xlane.xlu0 %2622 }
0x1d67   :  { %v2630_v49 = vsub.f32 %v2620_v36, %v2628_v47  ;;  %v2627_v40 = vmul.f32 0.03125, %v2623_v32 }
0x1d69   :  { %v2629_v26 = vsub.f32 %v2619_v16, %v2627_v40  ;;  %v2632_v43 = vmul.f32 %v2630_v49, %v2630_v49 }
0x1d6b   :  { %v2636_v45 = vsel %vm36_vm0, %v2632_v43, 0.0  ;;  %v2631_v44 = vmul.f32 %v2629_v26, %v2629_v26 }
0x1d6c   :  { %2637 = vadd.xlane.f32.xlu1 %v2636_v45 }
0x1d6d   :  { %v2633_v46 = vsel %vm36_vm0, %v2631_v44, 0.0 }
0x1d6e   :  { %2634 = vadd.xlane.f32.xlu0 %v2633_v46 }
0x1df5   :  { %v2638_v50 = vpop.xlane.xlu1 %2637 }
0x1df6   :  { %v2640_v53 = vmul.f32 0.03125, %v2638_v50 }
0x1df7   :  { %v2635_v54 = vpop.xlane.xlu0 %2634 }
0x1df8   :  { %v2642_v55 = vadd.f32 1e-12, %v2640_v53  ;;  %v2639_v56 = vmul.f32 0.03125, %v2635_v54 }
0x1dfa   :  { %3347 = vrsqrt.f32 %v2642_v55  ;;  %v2641_v57 = vadd.f32 1e-12, %v2639_v56 }
0x1dfc   :  { %3349 = vrsqrt.f32 %v2641_v57 }
0x1e07   :  { %v3348_v58 = vpop.eup %3347 }
0x1e08   :  { %v2646_v61 = vmul.f32 %v3348_v58, %v2630_v49 }
0x1e09   :  { %v3350_v62 = vpop.eup %3349 }
0x1e0a   :  { %v2645_v63 = vmul.f32 %v3350_v62, %v2629_v26  ;;  %v2652_v1 = vmul.f32 %v2650_v60, %v2646_v61 }
0x1e0c   :  { %v2651_v59 = vmul.f32 %v2650_v60, %v2645_v63  ;;  %v2658_v2 = vadd.f32 %v2656_v0, %v2652_v1 }
0x1e0e   :  { %v2657_v42 = vadd.f32 %v2656_v0, %v2651_v59 }
0x1e10   :  { %3242 = vmatprep.mubr.msk.f32.mxu1 %vm36_vm0, %v2657_v42 }
0x1e11   :  { %3243 = vmatmul.mubr.msk.f32.vlgmr.msra.gmra.mxu1 %vm36_vm0, %v2658_v2 }
0x1ed1   :  { %v3244_v28 = vpop.f32.mrf.mxu1 }
0x1ed2   :  { %v2745_v7 = vadd.f32 %v3244_v28, %v2666_v4 }
0x1ed3   :  { %v2739_v6 = vpop.f32.mrf.mxu1 }
0x1ed4   :  { %2749 = vst [vmem:[%s4029_s8 + $0x8] sm:$0xff] %v2745_v7  ;;  %v2740_v8 = vadd.f32 %v2739_v6, %v2666_v4 }
0x1ed6   :  { %2748 = vst [vmem:[%s4029_s8] sm:$0xff] %v2740_v8 }

</bundles_post_ra>
